<compile_context>
chip_gen: v7x
topology: tpu7x:2x2x1
jax: 0.10.0
libtpu: 0.0.40
codegen_flags: <defaults>
</compile_context>

<pallas_src>
import functools

import jax
import jax.numpy as jnp
from jax.experimental import pallas as pl
from jax.experimental.pallas import tpu as pltpu

KSIZE = 4          # all convs in the pix2pix U-Net are 4x4
BN_EPS = 1e-5      # PyTorch BatchNorm2d default eps
LANE = 128         # TPU lane width


# ----------------------------------------------------------------------------
# Pallas kernel: tiled matmul, K-reduction accumulator, fused shift (+tanh)
# ----------------------------------------------------------------------------
def _mm_kernel(a_ref, w_ref, s_ref, o_ref, acc_ref, *, final_tanh):
    @pl.when(pl.program_id(2) == 0)
    def _():
        acc_ref[...] = jnp.zeros_like(acc_ref)

    acc_ref[...] += jnp.dot(a_ref[...], w_ref[...],
                            preferred_element_type=jnp.float32)   # bf16 MXU

    @pl.when(pl.program_id(2) == pl.num_programs(2) - 1)
    def _():
        y = acc_ref[...] + s_ref[...]       # folded conv-bias + BatchNorm shift
        if final_tanh:
            y = jnp.tanh(y)                 # outermost nn.Tanh()
        o_ref[...] = y.astype(o_ref.dtype)


def _pick_tile(dim, candidates):
    for t in candidates:
        if dim > t and dim % t == 0:
            return t
    return dim          # full-dim block (always legal on TPU)


def matmul_shift_act(patches, w, shift, *, final_tanh, out_dtype):
    """(M, K) @ (K, N) + shift [+ tanh]; bf16 MXU inputs, f32 accumulation."""
    m, k = patches.shape
    k2, n = w.shape
    assert k == k2 and shift.shape == (1, n)
    tm = _pick_tile(m, (512, 256, 128))   # first block dim: mult of 8 or full
    tk = _pick_tile(k, (512, 256, 128))   # lane dim of patches: 128-mult or full
    tn = _pick_tile(n, (256, 128))        # lane dim of weights / output
    grid = (m // tm, n // tn, k // tk)    # reduction axis LAST
    kernel = functools.partial(_mm_kernel, final_tanh=final_tanh)
    return pl.pallas_call(
        kernel,
        out_shape=jax.ShapeDtypeStruct((m, n), out_dtype),
        grid=grid,
        in_specs=[
            pl.BlockSpec((tm, tk), lambda i, j, kk: (i, kk)),
            pl.BlockSpec((tk, tn), lambda i, j, kk: (kk, j)),
            pl.BlockSpec((1, tn), lambda i, j, kk: (0, j)),
        ],
        out_specs=pl.BlockSpec((tm, tn), lambda i, j, kk: (i, j)),
        scratch_shapes=[pltpu.VMEM((tm, tn), jnp.float32)],
        compiler_params=pltpu.CompilerParams(
            dimension_semantics=("parallel", "parallel", "arbitrary"),
            vmem_limit_bytes=32 * 1024 * 1024,
        ),
    )(patches, w, shift)


# ----------------------------------------------------------------------------
# ConvModule wrappers (im2col / sub-pixel glue in plain JAX)
# ----------------------------------------------------------------------------
def _act(x, kind):
    if kind is None:
        return x
    if kind == "leaky_relu":            # nn.LeakyReLU(negative_slope=0.2)
        return jnp.where(x >= 0, x, x * 0.2)
    if kind == "relu":                  # nn.ReLU
        return jnp.maximum(x, 0)
    raise ValueError(kind)


def conv_down(x, p):
    """ConvModule(Conv2d k=4 s=2 p=1, BN, act; order=('act','conv','norm'))."""
    xa = _act(x, p["act"])                              # once per element
    xp = jnp.pad(xa, ((0, 0), (1, 1), (1, 1), (0, 0)))
    n, hp, wp, c = xp.shape
    ho, wo = (hp - KSIZE) // 2 + 1, (wp - KSIZE) // 2 + 1
    cols = []
    for kh in range(KSIZE):
        for kw in range(KSIZE):
            cols.append(xp[:, kh:kh + 2 * ho - 1:2, kw:kw + 2 * wo - 1:2, :])
    patches = jnp.stack(cols, axis=3).reshape(n * ho * wo, KSIZE * KSIZE * c)
    y = matmul_shift_act(patches, p["w"][0], p["shift"],
                         final_tanh=False, out_dtype=p["out_dtype"])
    return y[:, :p["cout"]].reshape(n, ho, wo, p["cout"])


def deconv_up(x, p):
    """ConvModule(ConvTranspose2d k=4 s=2 p=1, BN, ReLU [+ Tanh outermost]).

    Sub-pixel decomposition: each output parity (ph, pw) is a 2x2 stride-1
    conv over the pad-1 input, so no zero-stuffed input is ever built.
    """
    xa = _act(x, p["act"])
    xp = jnp.pad(xa, ((0, 0), (1, 1), (1, 1), (0, 0)))
    n, h, w, c = xa.shape
    cout = p["cout"]
    rows = []
    for ph in range(2):
        cols_out = []
        for pw in range(2):
            taps = []
            for dy in range(2):
                for dx in range(2):
                    taps.append(xp[:, ph + dy:ph + dy + h,
                                   pw + dx:pw + dx + w, :])
            patches = jnp.stack(taps, axis=3).reshape(n * h * w, 4 * c)
            y = matmul_shift_act(patches, p["w"][2 * ph + pw], p["shift"],
                                 final_tanh=p["tanh"], out_dtype=p["out_dtype"])
            cols_out.append(y[:, :cout].reshape(n, h, w, cout))
        rows.append(jnp.stack(cols_out, axis=3))        # (n, h, w, 2, cout)
    y = jnp.stack(rows, axis=2)                         # (n, h, 2, w, 2, cout)
    return y.reshape(n, 2 * h, 2 * w, cout)             # interleave parities


# ----------------------------------------------------------------------------
# Parameters: normal(0, 0.02) weights, bias=0, BN gamma~N(1,0.02), beta=0,
# running stats (0, 1).  BN scale folded into weights; bias+BN shift folded
# into a single per-channel shift; weights stored in bf16.
# ----------------------------------------------------------------------------
def _conv_params(key, k_dim, cout, *, norm, act, tanh, out_dtype, num_mats,
                 gain=0.02):
    keys = jax.random.split(key, num_mats + 1)
    ws = [gain * jax.random.normal(keys[i], (k_dim, cout), jnp.float32)
          for i in range(num_mats)]
    bias = jnp.zeros((cout,), jnp.float32)
    if norm:                                            # eval-mode BatchNorm2d
        gamma = 1.0 + gain * jax.random.normal(keys[-1], (cout,), jnp.float32)
        beta = jnp.zeros((cout,), jnp.float32)
        r_mean = jnp.zeros((cout,), jnp.float32)
        r_var = jnp.ones((cout,), jnp.float32)
        scale = gamma / jnp.sqrt(r_var + BN_EPS)
        bn_shift = beta - r_mean * scale
    else:
        scale = jnp.ones((cout,), jnp.float32)
        bn_shift = jnp.zeros((cout,), jnp.float32)
    # (x @ w + b) * scale + sh  ==  x @ (w * scale) + (b * scale + sh)
    ws = [w * scale[None, :] for w in ws]
    shift = bias * scale + bn_shift
    # Pad Cout to a full 128-lane width (sliced off in the wrapper).
    cpad = LANE - cout if cout < LANE else 0
    if cpad:
        ws = [jnp.pad(w, ((0, 0), (0, cpad))) for w in ws]
        shift = jnp.pad(shift, ((0, cpad),))
    return dict(
        w=[w.astype(jnp.bfloat16) for w in ws],
        shift=shift.reshape(1, -1).astype(jnp.float32),
        act=act, tanh=tanh, cout=cout, out_dtype=out_dtype,
    )


def build_pix2pix_unet_params(key, in_channels, out_channels,
                              num_down=8, base_channels=64):
    keys = iter(jax.random.split(key, 2 * num_down + 4))

    def make_block(outer_ch, inner_ch, in_ch=None, submodule=None,
                   is_outermost=False, is_innermost=False):
        if in_ch is None:
            in_ch = outer_ch
        up_in = inner_ch if is_innermost else inner_ch * 2
        down = _conv_params(
            next(keys), KSIZE * KSIZE * in_ch, inner_ch,
            norm=not (is_outermost or is_innermost),
            act=None if is_outermost else "leaky_relu",
            tanh=False, out_dtype=jnp.bfloat16, num_mats=1)
        up = _conv_params(
            next(keys), 4 * up_in, outer_ch,            # K per output parity
            norm=not is_outermost, act="relu", tanh=is_outermost,
            out_dtype=jnp.float32 if is_outermost else jnp.bfloat16,
            num_mats=4)
        return dict(down=down, up=up, submodule=submodule,
                    is_outermost=is_outermost)

    blk = make_block(base_channels * 8, base_channels * 8, is_innermost=True)
    for _ in range(num_down - 5):
        blk = make_block(base_channels * 8, base_channels * 8, submodule=blk)
    blk = make_block(base_channels * 4, base_channels * 8, submodule=blk)
    blk = make_block(base_channels * 2, base_channels * 4, submodule=blk)
    blk = make_block(base_channels, base_channels * 2, submodule=blk)
    blk = make_block(out_channels, base_channels, in_ch=in_channels,
                     submodule=blk, is_outermost=True)
    return blk


# ----------------------------------------------------------------------------
# Forward (recursive UnetSkipConnectionBlock)
# ----------------------------------------------------------------------------
def block_forward(x, blk):
    h = conv_down(x, blk["down"])                 # act -> conv -> norm
    m = block_forward(h, blk["submodule"]) if blk["submodule"] is not None else h
    y = deconv_up(m, blk["up"])                   # act -> deconv -> norm (-> tanh)
    if blk["is_outermost"]:
        return y
    # TODO(synk): the skip concat still round-trips HBM; it could be fused by
    # splitting the consuming up-conv weight along K into an x-part + y-part.
    return jnp.concatenate([x, y], axis=-1)       # torch.cat([x, model(x)], 1)


def pix2pix_unet_forward(params, x_nchw):
    x = jnp.transpose(x_nchw, (0, 2, 3, 1)).astype(jnp.bfloat16)  # NCHW -> NHWC
    y = block_forward(x, params)
    return jnp.transpose(y, (0, 3, 1, 2)).astype(jnp.float32)     # NHWC -> NCHW


# ----------------------------------------------------------------------------
if __name__ == "__main__":
    key = jax.random.PRNGKey(0)
    k_params, k_x = jax.random.split(key)

    # Small config: num_down=5 needs spatial >= 32 (bottleneck reaches 1x1).
    in_ch, out_ch, num_down, base = 3, 3, 5, 8
    params = build_pix2pix_unet_params(k_params, in_ch, out_ch,
                                       num_down=num_down, base_channels=base)

    x = jax.random.normal(k_x, (2, in_ch, 32, 32), jnp.float32)

    @jax.jit
    def fwd(inp):
        return pix2pix_unet_forward(params, inp)

    y = jax.block_until_ready(fwd(x))
    assert y.shape == (2, out_ch, 32, 32), y.shape
    assert bool(jnp.all(jnp.isfinite(y)))
    assert bool(jnp.all(jnp.abs(y) <= 1.0 + 1e-6))   # outermost Tanh
    print("KERNEL_OK")
</pallas_src>

<mosaic_0001>
module attributes {stable_mosaic.version = 11 : i64} {
  func.func @_mm_kernel(%arg0: i32, %arg1: i32, %arg2: i32, %arg3: memref<256x48xbf16, #tpu.memory_space<vmem>>, %arg4: memref<48x128xbf16, #tpu.memory_space<vmem>>, %arg5: memref<1x128xf32, #tpu.memory_space<vmem>>, %arg6: memref<256x128xbf16, #tpu.memory_space<vmem>>, %arg7: memref<256x128xf32, #tpu.memory_space<vmem>>) attributes {dimension_semantics = [#tpu.dimension_semantics<parallel>, #tpu.dimension_semantics<parallel>, #tpu.dimension_semantics<arbitrary>], iteration_bounds = array<i64: 2, 1, 1>, scalar_prefetch = 0 : i64, scratch_operands = 1 : i64, tpu.core_type = #tpu.core_type<tc>, window_params = [{transform_indices = @transform_0, window_bounds = array<i64: 256, 48>}, {transform_indices = @transform_1, window_bounds = array<i64: 48, 128>}, {transform_indices = @transform_2, window_bounds = array<i64: 1, 128>}, {transform_indices = @transform_3, window_bounds = array<i64: 256, 128>}]} {
    %c0_i32 = arith.constant 0 : i32
    %0 = arith.cmpi eq, %arg2, %c0_i32 : i32
    %1 = arith.extui %0 : i1 to i32
    %c0_i32_0 = arith.constant 0 : i32
    %2 = arith.cmpi ne, %1, %c0_i32_0 : i32
    scf.if %2 {
      %cst_10 = arith.constant 0.000000e+00 : f32
      %12 = vector.broadcast %cst_10 : f32 to vector<256x128xf32>
      %c0_11 = arith.constant 0 : index
      %c0_12 = arith.constant 0 : index
      %13 = vector.load %arg7[%c0_11, %c0_12] : memref<256x128xf32, #tpu.memory_space<vmem>>, vector<256x128xf32>
      tpu.vector_store %arg7[%c0_11, %c0_12], %12 {strides = array<i32>} : memref<256x128xf32, #tpu.memory_space<vmem>>, vector<256x128xf32>,
    } else {
    }
    %c0 = arith.constant 0 : index
    %c0_1 = arith.constant 0 : index
    %3 = vector.load %arg7[%c0, %c0_1] : memref<256x128xf32, #tpu.memory_space<vmem>>, vector<256x128xf32>
    %c0_2 = arith.constant 0 : index
    %c0_3 = arith.constant 0 : index
    %4 = vector.load %arg3[%c0_2, %c0_3] : memref<256x48xbf16, #tpu.memory_space<vmem>>, vector<256x48xbf16>
    %c0_4 = arith.constant 0 : index
    %c0_5 = arith.constant 0 : index
    %5 = vector.load %arg4[%c0_4, %c0_5] : memref<48x128xbf16, #tpu.memory_space<vmem>>, vector<48x128xbf16>
    %cst = arith.constant dense<0.000000e+00> : vector<256x128xf32>
    %6 = tpu.matmul %4, %5, %cst {dimension_numbers = #tpu.dot_dimension_numbers<[1], [0], [0], [1], [0, 0, 1, 1], [], []>} : vector<256x48xbf16>, vector<48x128xbf16>, vector<256x128xf32> -> vector<256x128xf32>
    %7 = arith.addf %3, %6 : vector<256x128xf32>
    %c0_6 = arith.constant 0 : index
    %c0_7 = arith.constant 0 : index
    %8 = vector.load %arg7[%c0_6, %c0_7] : memref<256x128xf32, #tpu.memory_space<vmem>>, vector<256x128xf32>
    tpu.vector_store %arg7[%c0_6, %c0_7], %7 {strides = array<i32>} : memref<256x128xf32, #tpu.memory_space<vmem>>, vector<256x128xf32>,
    %c0_i32_8 = arith.constant 0 : i32
    %9 = arith.cmpi eq, %arg2, %c0_i32_8 : i32
    %10 = arith.extui %9 : i1 to i32
    %c0_i32_9 = arith.constant 0 : i32
    %11 = arith.cmpi ne, %10, %c0_i32_9 : i32
    scf.if %11 {
      %c0_10 = arith.constant 0 : index
      %c0_11 = arith.constant 0 : index
      %12 = vector.load %arg7[%c0_10, %c0_11] : memref<256x128xf32, #tpu.memory_space<vmem>>, vector<256x128xf32>
      %c0_12 = arith.constant 0 : index
      %c0_13 = arith.constant 0 : index
      %13 = vector.load %arg5[%c0_12, %c0_13] : memref<1x128xf32, #tpu.memory_space<vmem>>, vector<1x128xf32>
      %14 = vector.broadcast %13 : vector<1x128xf32> to vector<256x128xf32>
      %15 = arith.addf %12, %14 : vector<256x128xf32>
      %16 = arith.truncf %15 : vector<256x128xf32> to vector<256x128xbf16>
      %c0_14 = arith.constant 0 : index
      %c0_15 = arith.constant 0 : index
      %17 = vector.load %arg6[%c0_14, %c0_15] : memref<256x128xbf16, #tpu.memory_space<vmem>>, vector<256x128xbf16>
      tpu.vector_store %arg6[%c0_14, %c0_15], %16 {strides = array<i32>} : memref<256x128xbf16, #tpu.memory_space<vmem>>, vector<256x128xbf16>,
    } else {
    }
    return
  }
  func.func @transform_0(%arg0: i32, %arg1: i32, %arg2: i32) -> (i32, i32) {
    %c0_i32 = arith.constant 0 : i32
    return %arg0, %arg2 : i32, i32
  }
  func.func @transform_1(%arg0: i32, %arg1: i32, %arg2: i32) -> (i32, i32) {
    %c0_i32 = arith.constant 0 : i32
    return %arg2, %arg1 : i32, i32
  }
  func.func @transform_2(%arg0: i32, %arg1: i32, %arg2: i32) -> (i32, i32) {
    %c0_i32 = arith.constant 0 : i32
    %c0_i32_0 = arith.constant 0 : i32
    return %c0_i32, %arg1 : i32, i32
  }
  func.func @transform_3(%arg0: i32, %arg1: i32, %arg2: i32) -> (i32, i32) {
    %c0_i32 = arith.constant 0 : i32
    return %arg0, %arg1 : i32, i32
  }
}

module attributes {stable_mosaic.version = 11 : i64} {
  func.func @_mm_kernel(%arg0: i32, %arg1: i32, %arg2: i32, %arg3: memref<128x128xbf16, #tpu.memory_space<vmem>>, %arg4: memref<128x128xbf16, #tpu.memory_space<vmem>>, %arg5: memref<1x128xf32, #tpu.memory_space<vmem>>, %arg6: memref<128x128xbf16, #tpu.memory_space<vmem>>, %arg7: memref<128x128xf32, #tpu.memory_space<vmem>>) attributes {dimension_semantics = [#tpu.dimension_semantics<parallel>, #tpu.dimension_semantics<parallel>, #tpu.dimension_semantics<arbitrary>], iteration_bounds = array<i64: 1, 1, 1>, scalar_prefetch = 0 : i64, scratch_operands = 1 : i64, tpu.core_type = #tpu.core_type<tc>, window_params = [{transform_indices = @transform_0, window_bounds = array<i64: 128, 128>}, {transform_indices = @transform_1, window_bounds = array<i64: 128, 128>}, {transform_indices = @transform_2, window_bounds = array<i64: 1, 128>}, {transform_indices = @transform_3, window_bounds = array<i64: 128, 128>}]} {
    %c0_i32 = arith.constant 0 : i32
    %0 = arith.cmpi eq, %arg2, %c0_i32 : i32
    %1 = arith.extui %0 : i1 to i32
    %c0_i32_0 = arith.constant 0 : i32
    %2 = arith.cmpi ne, %1, %c0_i32_0 : i32
    scf.if %2 {
      %cst_10 = arith.constant 0.000000e+00 : f32
      %12 = vector.broadcast %cst_10 : f32 to vector<128x128xf32>
      %c0_11 = arith.constant 0 : index
      %c0_12 = arith.constant 0 : index
      %13 = vector.load %arg7[%c0_11, %c0_12] : memref<128x128xf32, #tpu.memory_space<vmem>>, vector<128x128xf32>
      tpu.vector_store %arg7[%c0_11, %c0_12], %12 {strides = array<i32>} : memref<128x128xf32, #tpu.memory_space<vmem>>, vector<128x128xf32>,
    } else {
    }
    %c0 = arith.constant 0 : index
    %c0_1 = arith.constant 0 : index
    %3 = vector.load %arg7[%c0, %c0_1] : memref<128x128xf32, #tpu.memory_space<vmem>>, vector<128x128xf32>
    %c0_2 = arith.constant 0 : index
    %c0_3 = arith.constant 0 : index
    %4 = vector.load %arg3[%c0_2, %c0_3] : memref<128x128xbf16, #tpu.memory_space<vmem>>, vector<128x128xbf16>
    %c0_4 = arith.constant 0 : index
    %c0_5 = arith.constant 0 : index
    %5 = vector.load %arg4[%c0_4, %c0_5] : memref<128x128xbf16, #tpu.memory_space<vmem>>, vector<128x128xbf16>
    %cst = arith.constant dense<0.000000e+00> : vector<128x128xf32>
    %6 = tpu.matmul %4, %5, %cst {dimension_numbers = #tpu.dot_dimension_numbers<[1], [0], [0], [1], [0, 0, 1, 1], [], []>} : vector<128x128xbf16>, vector<128x128xbf16>, vector<128x128xf32> -> vector<128x128xf32>
    %7 = arith.addf %3, %6 : vector<128x128xf32>
    %c0_6 = arith.constant 0 : index
    %c0_7 = arith.constant 0 : index
    %8 = vector.load %arg7[%c0_6, %c0_7] : memref<128x128xf32, #tpu.memory_space<vmem>>, vector<128x128xf32>
    tpu.vector_store %arg7[%c0_6, %c0_7], %7 {strides = array<i32>} : memref<128x128xf32, #tpu.memory_space<vmem>>, vector<128x128xf32>,
    %c0_i32_8 = arith.constant 0 : i32
    %9 = arith.cmpi eq, %arg2, %c0_i32_8 : i32
    %10 = arith.extui %9 : i1 to i32
    %c0_i32_9 = arith.constant 0 : i32
    %11 = arith.cmpi ne, %10, %c0_i32_9 : i32
    scf.if %11 {
      %c0_10 = arith.constant 0 : index
      %c0_11 = arith.constant 0 : index
      %12 = vector.load %arg7[%c0_10, %c0_11] : memref<128x128xf32, #tpu.memory_space<vmem>>, vector<128x128xf32>
      %c0_12 = arith.constant 0 : index
      %c0_13 = arith.constant 0 : index
      %13 = vector.load %arg5[%c0_12, %c0_13] : memref<1x128xf32, #tpu.memory_space<vmem>>, vector<1x128xf32>
      %14 = vector.broadcast %13 : vector<1x128xf32> to vector<128x128xf32>
      %15 = arith.addf %12, %14 : vector<128x128xf32>
      %16 = arith.truncf %15 : vector<128x128xf32> to vector<128x128xbf16>
      %c0_14 = arith.constant 0 : index
      %c0_15 = arith.constant 0 : index
      %17 = vector.load %arg6[%c0_14, %c0_15] : memref<128x128xbf16, #tpu.memory_space<vmem>>, vector<128x128xbf16>
      tpu.vector_store %arg6[%c0_14, %c0_15], %16 {strides = array<i32>} : memref<128x128xbf16, #tpu.memory_space<vmem>>, vector<128x128xbf16>,
    } else {
    }
    return
  }
  func.func @transform_0(%arg0: i32, %arg1: i32, %arg2: i32) -> (i32, i32) {
    %c0_i32 = arith.constant 0 : i32
    return %arg0, %arg2 : i32, i32
  }
  func.func @transform_1(%arg0: i32, %arg1: i32, %arg2: i32) -> (i32, i32) {
    %c0_i32 = arith.constant 0 : i32
    return %arg2, %arg1 : i32, i32
  }
  func.func @transform_2(%arg0: i32, %arg1: i32, %arg2: i32) -> (i32, i32) {
    %c0_i32 = arith.constant 0 : i32
    %c0_i32_0 = arith.constant 0 : i32
    return %c0_i32, %arg1 : i32, i32
  }
  func.func @transform_3(%arg0: i32, %arg1: i32, %arg2: i32) -> (i32, i32) {
    %c0_i32 = arith.constant 0 : i32
    return %arg0, %arg1 : i32, i32
  }
}

module attributes {stable_mosaic.version = 11 : i64} {
  func.func @_mm_kernel(%arg0: i32, %arg1: i32, %arg2: i32, %arg3: memref<32x128xbf16, #tpu.memory_space<vmem>>, %arg4: memref<128x128xbf16, #tpu.memory_space<vmem>>, %arg5: memref<1x128xf32, #tpu.memory_space<vmem>>, %arg6: memref<32x128xbf16, #tpu.memory_space<vmem>>, %arg7: memref<32x128xf32, #tpu.memory_space<vmem>>) attributes {dimension_semantics = [#tpu.dimension_semantics<parallel>, #tpu.dimension_semantics<parallel>, #tpu.dimension_semantics<arbitrary>], iteration_bounds = array<i64: 1, 1, 2>, scalar_prefetch = 0 : i64, scratch_operands = 1 : i64, tpu.core_type = #tpu.core_type<tc>, window_params = [{transform_indices = @transform_0, window_bounds = array<i64: 32, 128>}, {transform_indices = @transform_1, window_bounds = array<i64: 128, 128>}, {transform_indices = @transform_2, window_bounds = array<i64: 1, 128>}, {transform_indices = @transform_3, window_bounds = array<i64: 32, 128>}]} {
    %c0_i32 = arith.constant 0 : i32
    %0 = arith.cmpi eq, %arg2, %c0_i32 : i32
    %1 = arith.extui %0 : i1 to i32
    %c0_i32_0 = arith.constant 0 : i32
    %2 = arith.cmpi ne, %1, %c0_i32_0 : i32
    scf.if %2 {
      %cst_9 = arith.constant 0.000000e+00 : f32
      %12 = vector.broadcast %cst_9 : f32 to vector<32x128xf32>
      %c0_10 = arith.constant 0 : index
      %c0_11 = arith.constant 0 : index
      %13 = vector.load %arg7[%c0_10, %c0_11] : memref<32x128xf32, #tpu.memory_space<vmem>>, vector<32x128xf32>
      tpu.vector_store %arg7[%c0_10, %c0_11], %12 {strides = array<i32>} : memref<32x128xf32, #tpu.memory_space<vmem>>, vector<32x128xf32>,
    } else {
    }
    %c0 = arith.constant 0 : index
    %c0_1 = arith.constant 0 : index
    %3 = vector.load %arg7[%c0, %c0_1] : memref<32x128xf32, #tpu.memory_space<vmem>>, vector<32x128xf32>
    %c0_2 = arith.constant 0 : index
    %c0_3 = arith.constant 0 : index
    %4 = vector.load %arg3[%c0_2, %c0_3] : memref<32x128xbf16, #tpu.memory_space<vmem>>, vector<32x128xbf16>
    %c0_4 = arith.constant 0 : index
    %c0_5 = arith.constant 0 : index
    %5 = vector.load %arg4[%c0_4, %c0_5] : memref<128x128xbf16, #tpu.memory_space<vmem>>, vector<128x128xbf16>
    %cst = arith.constant dense<0.000000e+00> : vector<32x128xf32>
    %6 = tpu.matmul %4, %5, %cst {dimension_numbers = #tpu.dot_dimension_numbers<[1], [0], [0], [1], [0, 0, 1, 1], [], []>} : vector<32x128xbf16>, vector<128x128xbf16>, vector<32x128xf32> -> vector<32x128xf32>
    %7 = arith.addf %3, %6 : vector<32x128xf32>
    %c0_6 = arith.constant 0 : index
    %c0_7 = arith.constant 0 : index
    %8 = vector.load %arg7[%c0_6, %c0_7] : memref<32x128xf32, #tpu.memory_space<vmem>>, vector<32x128xf32>
    tpu.vector_store %arg7[%c0_6, %c0_7], %7 {strides = array<i32>} : memref<32x128xf32, #tpu.memory_space<vmem>>, vector<32x128xf32>,
    %c1_i32 = arith.constant 1 : i32
    %9 = arith.cmpi eq, %arg2, %c1_i32 : i32
    %10 = arith.extui %9 : i1 to i32
    %c0_i32_8 = arith.constant 0 : i32
    %11 = arith.cmpi ne, %10, %c0_i32_8 : i32
    scf.if %11 {
      %c0_9 = arith.constant 0 : index
      %c0_10 = arith.constant 0 : index
      %12 = vector.load %arg7[%c0_9, %c0_10] : memref<32x128xf32, #tpu.memory_space<vmem>>, vector<32x128xf32>
      %c0_11 = arith.constant 0 : index
      %c0_12 = arith.constant 0 : index
      %13 = vector.load %arg5[%c0_11, %c0_12] : memref<1x128xf32, #tpu.memory_space<vmem>>, vector<1x128xf32>
      %14 = vector.broadcast %13 : vector<1x128xf32> to vector<32x128xf32>
      %15 = arith.addf %12, %14 : vector<32x128xf32>
      %16 = arith.truncf %15 : vector<32x128xf32> to vector<32x128xbf16>
      %c0_13 = arith.constant 0 : index
      %c0_14 = arith.constant 0 : index
      %17 = vector.load %arg6[%c0_13, %c0_14] : memref<32x128xbf16, #tpu.memory_space<vmem>>, vector<32x128xbf16>
      tpu.vector_store %arg6[%c0_13, %c0_14], %16 {strides = array<i32>} : memref<32x128xbf16, #tpu.memory_space<vmem>>, vector<32x128xbf16>,
    } else {
    }
    return
  }
  func.func @transform_0(%arg0: i32, %arg1: i32, %arg2: i32) -> (i32, i32) {
    %c0_i32 = arith.constant 0 : i32
    return %arg0, %arg2 : i32, i32
  }
  func.func @transform_1(%arg0: i32, %arg1: i32, %arg2: i32) -> (i32, i32) {
    %c0_i32 = arith.constant 0 : i32
    return %arg2, %arg1 : i32, i32
  }
  func.func @transform_2(%arg0: i32, %arg1: i32, %arg2: i32) -> (i32, i32) {
    %c0_i32 = arith.constant 0 : i32
    %c0_i32_0 = arith.constant 0 : i32
    return %c0_i32, %arg1 : i32, i32
  }
  func.func @transform_3(%arg0: i32, %arg1: i32, %arg2: i32) -> (i32, i32) {
    %c0_i32 = arith.constant 0 : i32
    return %arg0, %arg1 : i32, i32
  }
}

module attributes {stable_mosaic.version = 11 : i64} {
  func.func @_mm_kernel(%arg0: i32, %arg1: i32, %arg2: i32, %arg3: memref<2x512xbf16, #tpu.memory_space<vmem>>, %arg4: memref<512x128xbf16, #tpu.memory_space<vmem>>, %arg5: memref<1x128xf32, #tpu.memory_space<vmem>>, %arg6: memref<2x128xbf16, #tpu.memory_space<vmem>>, %arg7: memref<2x128xf32, #tpu.memory_space<vmem>>) attributes {dimension_semantics = [#tpu.dimension_semantics<parallel>, #tpu.dimension_semantics<parallel>, #tpu.dimension_semantics<arbitrary>], iteration_bounds = array<i64: 1, 1, 2>, scalar_prefetch = 0 : i64, scratch_operands = 1 : i64, tpu.core_type = #tpu.core_type<tc>, window_params = [{transform_indices = @transform_0, window_bounds = array<i64: 2, 512>}, {transform_indices = @transform_1, window_bounds = array<i64: 512, 128>}, {transform_indices = @transform_2, window_bounds = array<i64: 1, 128>}, {transform_indices = @transform_3, window_bounds = array<i64: 2, 128>}]} {
    %c0_i32 = arith.constant 0 : i32
    %0 = arith.cmpi eq, %arg2, %c0_i32 : i32
    %1 = arith.extui %0 : i1 to i32
    %c0_i32_0 = arith.constant 0 : i32
    %2 = arith.cmpi ne, %1, %c0_i32_0 : i32
    scf.if %2 {
      %cst_9 = arith.constant 0.000000e+00 : f32
      %12 = vector.broadcast %cst_9 : f32 to vector<2x128xf32>
      %c0_10 = arith.constant 0 : index
      %c0_11 = arith.constant 0 : index
      %13 = vector.load %arg7[%c0_10, %c0_11] : memref<2x128xf32, #tpu.memory_space<vmem>>, vector<2x128xf32>
      tpu.vector_store %arg7[%c0_10, %c0_11], %12 {strides = array<i32>} : memref<2x128xf32, #tpu.memory_space<vmem>>, vector<2x128xf32>,
    } else {
    }
    %c0 = arith.constant 0 : index
    %c0_1 = arith.constant 0 : index
    %3 = vector.load %arg7[%c0, %c0_1] : memref<2x128xf32, #tpu.memory_space<vmem>>, vector<2x128xf32>
    %c0_2 = arith.constant 0 : index
    %c0_3 = arith.constant 0 : index
    %4 = vector.load %arg3[%c0_2, %c0_3] : memref<2x512xbf16, #tpu.memory_space<vmem>>, vector<2x512xbf16>
    %c0_4 = arith.constant 0 : index
    %c0_5 = arith.constant 0 : index
    %5 = vector.load %arg4[%c0_4, %c0_5] : memref<512x128xbf16, #tpu.memory_space<vmem>>, vector<512x128xbf16>
    %cst = arith.constant dense<0.000000e+00> : vector<2x128xf32>
    %6 = tpu.matmul %4, %5, %cst {dimension_numbers = #tpu.dot_dimension_numbers<[1], [0], [0], [1], [0, 0, 1, 1], [], []>} : vector<2x512xbf16>, vector<512x128xbf16>, vector<2x128xf32> -> vector<2x128xf32>
    %7 = arith.addf %3, %6 : vector<2x128xf32>
    %c0_6 = arith.constant 0 : index
    %c0_7 = arith.constant 0 : index
    %8 = vector.load %arg7[%c0_6, %c0_7] : memref<2x128xf32, #tpu.memory_space<vmem>>, vector<2x128xf32>
    tpu.vector_store %arg7[%c0_6, %c0_7], %7 {strides = array<i32>} : memref<2x128xf32, #tpu.memory_space<vmem>>, vector<2x128xf32>,
    %c1_i32 = arith.constant 1 : i32
    %9 = arith.cmpi eq, %arg2, %c1_i32 : i32
    %10 = arith.extui %9 : i1 to i32
    %c0_i32_8 = arith.constant 0 : i32
    %11 = arith.cmpi ne, %10, %c0_i32_8 : i32
    scf.if %11 {
      %c0_9 = arith.constant 0 : index
      %c0_10 = arith.constant 0 : index
      %12 = vector.load %arg7[%c0_9, %c0_10] : memref<2x128xf32, #tpu.memory_space<vmem>>, vector<2x128xf32>
      %c0_11 = arith.constant 0 : index
      %c0_12 = arith.constant 0 : index
      %13 = vector.load %arg5[%c0_11, %c0_12] : memref<1x128xf32, #tpu.memory_space<vmem>>, vector<1x128xf32>
      %14 = vector.broadcast %13 : vector<1x128xf32> to vector<2x128xf32>
      %15 = arith.addf %12, %14 : vector<2x128xf32>
      %16 = arith.truncf %15 : vector<2x128xf32> to vector<2x128xbf16>
      %c0_13 = arith.constant 0 : index
      %c0_14 = arith.constant 0 : index
      %17 = vector.load %arg6[%c0_13, %c0_14] : memref<2x128xbf16, #tpu.memory_space<vmem>>, vector<2x128xbf16>
      tpu.vector_store %arg6[%c0_13, %c0_14], %16 {strides = array<i32>} : memref<2x128xbf16, #tpu.memory_space<vmem>>, vector<2x128xbf16>,
    } else {
    }
    return
  }
  func.func @transform_0(%arg0: i32, %arg1: i32, %arg2: i32) -> (i32, i32) {
    %c0_i32 = arith.constant 0 : i32
    return %arg0, %arg2 : i32, i32
  }
  func.func @transform_1(%arg0: i32, %arg1: i32, %arg2: i32) -> (i32, i32) {
    %c0_i32 = arith.constant 0 : i32
    return %arg2, %arg1 : i32, i32
  }
  func.func @transform_2(%arg0: i32, %arg1: i32, %arg2: i32) -> (i32, i32) {
    %c0_i32 = arith.constant 0 : i32
    %c0_i32_0 = arith.constant 0 : i32
    return %c0_i32, %arg1 : i32, i32
  }
  func.func @transform_3(%arg0: i32, %arg1: i32, %arg2: i32) -> (i32, i32) {
    %c0_i32 = arith.constant 0 : i32
    return %arg0, %arg1 : i32, i32
  }
}

module attributes {stable_mosaic.version = 11 : i64} {
  func.func @_mm_kernel(%arg0: i32, %arg1: i32, %arg2: i32, %arg3: memref<8x256xbf16, #tpu.memory_space<vmem>>, %arg4: memref<256x128xbf16, #tpu.memory_space<vmem>>, %arg5: memref<1x128xf32, #tpu.memory_space<vmem>>, %arg6: memref<8x128xbf16, #tpu.memory_space<vmem>>, %arg7: memref<8x128xf32, #tpu.memory_space<vmem>>) attributes {dimension_semantics = [#tpu.dimension_semantics<parallel>, #tpu.dimension_semantics<parallel>, #tpu.dimension_semantics<arbitrary>], iteration_bounds = array<i64: 1, 1, 2>, scalar_prefetch = 0 : i64, scratch_operands = 1 : i64, tpu.core_type = #tpu.core_type<tc>, window_params = [{transform_indices = @transform_0, window_bounds = array<i64: 8, 256>}, {transform_indices = @transform_1, window_bounds = array<i64: 256, 128>}, {transform_indices = @transform_2, window_bounds = array<i64: 1, 128>}, {transform_indices = @transform_3, window_bounds = array<i64: 8, 128>}]} {
    %c0_i32 = arith.constant 0 : i32
    %0 = arith.cmpi eq, %arg2, %c0_i32 : i32
    %1 = arith.extui %0 : i1 to i32
    %c0_i32_0 = arith.constant 0 : i32
    %2 = arith.cmpi ne, %1, %c0_i32_0 : i32
    scf.if %2 {
      %cst_9 = arith.constant 0.000000e+00 : f32
      %12 = vector.broadcast %cst_9 : f32 to vector<8x128xf32>
      %c0_10 = arith.constant 0 : index
      %c0_11 = arith.constant 0 : index
      %13 = vector.load %arg7[%c0_10, %c0_11] : memref<8x128xf32, #tpu.memory_space<vmem>>, vector<8x128xf32>
      tpu.vector_store %arg7[%c0_10, %c0_11], %12 {strides = array<i32>} : memref<8x128xf32, #tpu.memory_space<vmem>>, vector<8x128xf32>,
    } else {
    }
    %c0 = arith.constant 0 : index
    %c0_1 = arith.constant 0 : index
    %3 = vector.load %arg7[%c0, %c0_1] : memref<8x128xf32, #tpu.memory_space<vmem>>, vector<8x128xf32>
    %c0_2 = arith.constant 0 : index
    %c0_3 = arith.constant 0 : index
    %4 = vector.load %arg3[%c0_2, %c0_3] : memref<8x256xbf16, #tpu.memory_space<vmem>>, vector<8x256xbf16>
    %c0_4 = arith.constant 0 : index
    %c0_5 = arith.constant 0 : index
    %5 = vector.load %arg4[%c0_4, %c0_5] : memref<256x128xbf16, #tpu.memory_space<vmem>>, vector<256x128xbf16>
    %cst = arith.constant dense<0.000000e+00> : vector<8x128xf32>
    %6 = tpu.matmul %4, %5, %cst {dimension_numbers = #tpu.dot_dimension_numbers<[1], [0], [0], [1], [0, 0, 1, 1], [], []>} : vector<8x256xbf16>, vector<256x128xbf16>, vector<8x128xf32> -> vector<8x128xf32>
    %7 = arith.addf %3, %6 : vector<8x128xf32>
    %c0_6 = arith.constant 0 : index
    %c0_7 = arith.constant 0 : index
    %8 = vector.load %arg7[%c0_6, %c0_7] : memref<8x128xf32, #tpu.memory_space<vmem>>, vector<8x128xf32>
    tpu.vector_store %arg7[%c0_6, %c0_7], %7 {strides = array<i32>} : memref<8x128xf32, #tpu.memory_space<vmem>>, vector<8x128xf32>,
    %c1_i32 = arith.constant 1 : i32
    %9 = arith.cmpi eq, %arg2, %c1_i32 : i32
    %10 = arith.extui %9 : i1 to i32
    %c0_i32_8 = arith.constant 0 : i32
    %11 = arith.cmpi ne, %10, %c0_i32_8 : i32
    scf.if %11 {
      %c0_9 = arith.constant 0 : index
      %c0_10 = arith.constant 0 : index
      %12 = vector.load %arg7[%c0_9, %c0_10] : memref<8x128xf32, #tpu.memory_space<vmem>>, vector<8x128xf32>
      %c0_11 = arith.constant 0 : index
      %c0_12 = arith.constant 0 : index
      %13 = vector.load %arg5[%c0_11, %c0_12] : memref<1x128xf32, #tpu.memory_space<vmem>>, vector<1x128xf32>
      %14 = vector.broadcast %13 : vector<1x128xf32> to vector<8x128xf32>
      %15 = arith.addf %12, %14 : vector<8x128xf32>
      %16 = arith.truncf %15 : vector<8x128xf32> to vector<8x128xbf16>
      %c0_13 = arith.constant 0 : index
      %c0_14 = arith.constant 0 : index
      %17 = vector.load %arg6[%c0_13, %c0_14] : memref<8x128xbf16, #tpu.memory_space<vmem>>, vector<8x128xbf16>
      tpu.vector_store %arg6[%c0_13, %c0_14], %16 {strides = array<i32>} : memref<8x128xbf16, #tpu.memory_space<vmem>>, vector<8x128xbf16>,
    } else {
    }
    return
  }
  func.func @transform_0(%arg0: i32, %arg1: i32, %arg2: i32) -> (i32, i32) {
    %c0_i32 = arith.constant 0 : i32
    return %arg0, %arg2 : i32, i32
  }
  func.func @transform_1(%arg0: i32, %arg1: i32, %arg2: i32) -> (i32, i32) {
    %c0_i32 = arith.constant 0 : i32
    return %arg2, %arg1 : i32, i32
  }
  func.func @transform_2(%arg0: i32, %arg1: i32, %arg2: i32) -> (i32, i32) {
    %c0_i32 = arith.constant 0 : i32
    %c0_i32_0 = arith.constant 0 : i32
    return %c0_i32, %arg1 : i32, i32
  }
  func.func @transform_3(%arg0: i32, %arg1: i32, %arg2: i32) -> (i32, i32) {
    %c0_i32 = arith.constant 0 : i32
    return %arg0, %arg1 : i32, i32
  }
}

module attributes {stable_mosaic.version = 11 : i64} {
  func.func @_mm_kernel(%arg0: i32, %arg1: i32, %arg2: i32, %arg3: memref<2x128xbf16, #tpu.memory_space<vmem>>, %arg4: memref<128x128xbf16, #tpu.memory_space<vmem>>, %arg5: memref<1x128xf32, #tpu.memory_space<vmem>>, %arg6: memref<2x128xbf16, #tpu.memory_space<vmem>>, %arg7: memref<2x128xf32, #tpu.memory_space<vmem>>) attributes {dimension_semantics = [#tpu.dimension_semantics<parallel>, #tpu.dimension_semantics<parallel>, #tpu.dimension_semantics<arbitrary>], iteration_bounds = array<i64: 1, 1, 2>, scalar_prefetch = 0 : i64, scratch_operands = 1 : i64, tpu.core_type = #tpu.core_type<tc>, window_params = [{transform_indices = @transform_0, window_bounds = array<i64: 2, 128>}, {transform_indices = @transform_1, window_bounds = array<i64: 128, 128>}, {transform_indices = @transform_2, window_bounds = array<i64: 1, 128>}, {transform_indices = @transform_3, window_bounds = array<i64: 2, 128>}]} {
    %c0_i32 = arith.constant 0 : i32
    %0 = arith.cmpi eq, %arg2, %c0_i32 : i32
    %1 = arith.extui %0 : i1 to i32
    %c0_i32_0 = arith.constant 0 : i32
    %2 = arith.cmpi ne, %1, %c0_i32_0 : i32
    scf.if %2 {
      %cst_9 = arith.constant 0.000000e+00 : f32
      %12 = vector.broadcast %cst_9 : f32 to vector<2x128xf32>
      %c0_10 = arith.constant 0 : index
      %c0_11 = arith.constant 0 : index
      %13 = vector.load %arg7[%c0_10, %c0_11] : memref<2x128xf32, #tpu.memory_space<vmem>>, vector<2x128xf32>
      tpu.vector_store %arg7[%c0_10, %c0_11], %12 {strides = array<i32>} : memref<2x128xf32, #tpu.memory_space<vmem>>, vector<2x128xf32>,
    } else {
    }
    %c0 = arith.constant 0 : index
    %c0_1 = arith.constant 0 : index
    %3 = vector.load %arg7[%c0, %c0_1] : memref<2x128xf32, #tpu.memory_space<vmem>>, vector<2x128xf32>
    %c0_2 = arith.constant 0 : index
    %c0_3 = arith.constant 0 : index
    %4 = vector.load %arg3[%c0_2, %c0_3] : memref<2x128xbf16, #tpu.memory_space<vmem>>, vector<2x128xbf16>
    %c0_4 = arith.constant 0 : index
    %c0_5 = arith.constant 0 : index
    %5 = vector.load %arg4[%c0_4, %c0_5] : memref<128x128xbf16, #tpu.memory_space<vmem>>, vector<128x128xbf16>
    %cst = arith.constant dense<0.000000e+00> : vector<2x128xf32>
    %6 = tpu.matmul %4, %5, %cst {dimension_numbers = #tpu.dot_dimension_numbers<[1], [0], [0], [1], [0, 0, 1, 1], [], []>} : vector<2x128xbf16>, vector<128x128xbf16>, vector<2x128xf32> -> vector<2x128xf32>
    %7 = arith.addf %3, %6 : vector<2x128xf32>
    %c0_6 = arith.constant 0 : index
    %c0_7 = arith.constant 0 : index
    %8 = vector.load %arg7[%c0_6, %c0_7] : memref<2x128xf32, #tpu.memory_space<vmem>>, vector<2x128xf32>
    tpu.vector_store %arg7[%c0_6, %c0_7], %7 {strides = array<i32>} : memref<2x128xf32, #tpu.memory_space<vmem>>, vector<2x128xf32>,
    %c1_i32 = arith.constant 1 : i32
    %9 = arith.cmpi eq, %arg2, %c1_i32 : i32
    %10 = arith.extui %9 : i1 to i32
    %c0_i32_8 = arith.constant 0 : i32
    %11 = arith.cmpi ne, %10, %c0_i32_8 : i32
    scf.if %11 {
      %c0_9 = arith.constant 0 : index
      %c0_10 = arith.constant 0 : index
      %12 = vector.load %arg7[%c0_9, %c0_10] : memref<2x128xf32, #tpu.memory_space<vmem>>, vector<2x128xf32>
      %c0_11 = arith.constant 0 : index
      %c0_12 = arith.constant 0 : index
      %13 = vector.load %arg5[%c0_11, %c0_12] : memref<1x128xf32, #tpu.memory_space<vmem>>, vector<1x128xf32>
      %14 = vector.broadcast %13 : vector<1x128xf32> to vector<2x128xf32>
      %15 = arith.addf %12, %14 : vector<2x128xf32>
      %16 = arith.truncf %15 : vector<2x128xf32> to vector<2x128xbf16>
      %c0_13 = arith.constant 0 : index
      %c0_14 = arith.constant 0 : index
      %17 = vector.load %arg6[%c0_13, %c0_14] : memref<2x128xbf16, #tpu.memory_space<vmem>>, vector<2x128xbf16>
      tpu.vector_store %arg6[%c0_13, %c0_14], %16 {strides = array<i32>} : memref<2x128xbf16, #tpu.memory_space<vmem>>, vector<2x128xbf16>,
    } else {
    }
    return
  }
  func.func @transform_0(%arg0: i32, %arg1: i32, %arg2: i32) -> (i32, i32) {
    %c0_i32 = arith.constant 0 : i32
    return %arg0, %arg2 : i32, i32
  }
  func.func @transform_1(%arg0: i32, %arg1: i32, %arg2: i32) -> (i32, i32) {
    %c0_i32 = arith.constant 0 : i32
    return %arg2, %arg1 : i32, i32
  }
  func.func @transform_2(%arg0: i32, %arg1: i32, %arg2: i32) -> (i32, i32) {
    %c0_i32 = arith.constant 0 : i32
    %c0_i32_0 = arith.constant 0 : i32
    return %c0_i32, %arg1 : i32, i32
  }
  func.func @transform_3(%arg0: i32, %arg1: i32, %arg2: i32) -> (i32, i32) {
    %c0_i32 = arith.constant 0 : i32
    return %arg0, %arg1 : i32, i32
  }
}

module attributes {stable_mosaic.version = 11 : i64} {
  func.func @_mm_kernel(%arg0: i32, %arg1: i32, %arg2: i32, %arg3: memref<256x64xbf16, #tpu.memory_space<vmem>>, %arg4: memref<64x128xbf16, #tpu.memory_space<vmem>>, %arg5: memref<1x128xf32, #tpu.memory_space<vmem>>, %arg6: memref<256x128xf32, #tpu.memory_space<vmem>>, %arg7: memref<256x128xf32, #tpu.memory_space<vmem>>) attributes {dimension_semantics = [#tpu.dimension_semantics<parallel>, #tpu.dimension_semantics<parallel>, #tpu.dimension_semantics<arbitrary>], iteration_bounds = array<i64: 2, 1, 1>, scalar_prefetch = 0 : i64, scratch_operands = 1 : i64, tpu.core_type = #tpu.core_type<tc>, window_params = [{transform_indices = @transform_0, window_bounds = array<i64: 256, 64>}, {transform_indices = @transform_1, window_bounds = array<i64: 64, 128>}, {transform_indices = @transform_2, window_bounds = array<i64: 1, 128>}, {transform_indices = @transform_3, window_bounds = array<i64: 256, 128>}]} {
    %c0_i32 = arith.constant 0 : i32
    %0 = arith.cmpi eq, %arg2, %c0_i32 : i32
    %1 = arith.extui %0 : i1 to i32
    %c0_i32_0 = arith.constant 0 : i32
    %2 = arith.cmpi ne, %1, %c0_i32_0 : i32
    scf.if %2 {
      %cst_10 = arith.constant 0.000000e+00 : f32
      %12 = vector.broadcast %cst_10 : f32 to vector<256x128xf32>
      %c0_11 = arith.constant 0 : index
      %c0_12 = arith.constant 0 : index
      %13 = vector.load %arg7[%c0_11, %c0_12] : memref<256x128xf32, #tpu.memory_space<vmem>>, vector<256x128xf32>
      tpu.vector_store %arg7[%c0_11, %c0_12], %12 {strides = array<i32>} : memref<256x128xf32, #tpu.memory_space<vmem>>, vector<256x128xf32>,
    } else {
    }
    %c0 = arith.constant 0 : index
    %c0_1 = arith.constant 0 : index
    %3 = vector.load %arg7[%c0, %c0_1] : memref<256x128xf32, #tpu.memory_space<vmem>>, vector<256x128xf32>
    %c0_2 = arith.constant 0 : index
    %c0_3 = arith.constant 0 : index
    %4 = vector.load %arg3[%c0_2, %c0_3] : memref<256x64xbf16, #tpu.memory_space<vmem>>, vector<256x64xbf16>
    %c0_4 = arith.constant 0 : index
    %c0_5 = arith.constant 0 : index
    %5 = vector.load %arg4[%c0_4, %c0_5] : memref<64x128xbf16, #tpu.memory_space<vmem>>, vector<64x128xbf16>
    %cst = arith.constant dense<0.000000e+00> : vector<256x128xf32>
    %6 = tpu.matmul %4, %5, %cst {dimension_numbers = #tpu.dot_dimension_numbers<[1], [0], [0], [1], [0, 0, 1, 1], [], []>} : vector<256x64xbf16>, vector<64x128xbf16>, vector<256x128xf32> -> vector<256x128xf32>
    %7 = arith.addf %3, %6 : vector<256x128xf32>
    %c0_6 = arith.constant 0 : index
    %c0_7 = arith.constant 0 : index
    %8 = vector.load %arg7[%c0_6, %c0_7] : memref<256x128xf32, #tpu.memory_space<vmem>>, vector<256x128xf32>
    tpu.vector_store %arg7[%c0_6, %c0_7], %7 {strides = array<i32>} : memref<256x128xf32, #tpu.memory_space<vmem>>, vector<256x128xf32>,
    %c0_i32_8 = arith.constant 0 : i32
    %9 = arith.cmpi eq, %arg2, %c0_i32_8 : i32
    %10 = arith.extui %9 : i1 to i32
    %c0_i32_9 = arith.constant 0 : i32
    %11 = arith.cmpi ne, %10, %c0_i32_9 : i32
    scf.if %11 {
      %c0_10 = arith.constant 0 : index
      %c0_11 = arith.constant 0 : index
      %12 = vector.load %arg7[%c0_10, %c0_11] : memref<256x128xf32, #tpu.memory_space<vmem>>, vector<256x128xf32>
      %c0_12 = arith.constant 0 : index
      %c0_13 = arith.constant 0 : index
      %13 = vector.load %arg5[%c0_12, %c0_13] : memref<1x128xf32, #tpu.memory_space<vmem>>, vector<1x128xf32>
      %14 = vector.broadcast %13 : vector<1x128xf32> to vector<256x128xf32>
      %15 = arith.addf %12, %14 : vector<256x128xf32>
      %16 = math.tanh %15 : vector<256x128xf32>
      %c0_14 = arith.constant 0 : index
      %c0_15 = arith.constant 0 : index
      %17 = vector.load %arg6[%c0_14, %c0_15] : memref<256x128xf32, #tpu.memory_space<vmem>>, vector<256x128xf32>
      tpu.vector_store %arg6[%c0_14, %c0_15], %16 {strides = array<i32>} : memref<256x128xf32, #tpu.memory_space<vmem>>, vector<256x128xf32>,
    } else {
    }
    return
  }
  func.func @transform_0(%arg0: i32, %arg1: i32, %arg2: i32) -> (i32, i32) {
    %c0_i32 = arith.constant 0 : i32
    return %arg0, %arg2 : i32, i32
  }
  func.func @transform_1(%arg0: i32, %arg1: i32, %arg2: i32) -> (i32, i32) {
    %c0_i32 = arith.constant 0 : i32
    return %arg2, %arg1 : i32, i32
  }
  func.func @transform_2(%arg0: i32, %arg1: i32, %arg2: i32) -> (i32, i32) {
    %c0_i32 = arith.constant 0 : i32
    %c0_i32_0 = arith.constant 0 : i32
    return %c0_i32, %arg1 : i32, i32
  }
  func.func @transform_3(%arg0: i32, %arg1: i32, %arg2: i32) -> (i32, i32) {
    %c0_i32 = arith.constant 0 : i32
    return %arg0, %arg1 : i32, i32
  }
}

</mosaic_0001>

<bundles_post_ra>
// kernel: fwd.25
= control target key start
LH: loop header
LB: loop body
LE: loop exit
PB: predicated region body
PF: predicated region fallthrough
CT: control target
= control target key end

     0   :  { %s1441_s12 = smov 0   ;;  %s1443_s13 = smov 0   ;;  %s1579_s0 = inlined_call_operand.vmem [shape: bf16[512,48], index: 0, kind: input, shape index: {}]   ;;  %s1580_s1 = inlined_call_operand.vmem [shape: bf16[48,128], index: 1, kind: input, shape index: {}]   ;;  %s1581_s2 = inlined_call_operand.vmem [shape: f32[1,128], index: 2, kind: input, shape index: {}]   ;;  %s1582_s3 = inlined_call_operand.vmem [shape: bf16[512,128], index: 3, kind: output, shape index: {}]  }
   0x1   :  { %s1445_s14 = smov 0  }
   0x2 LB: > { %s32_s15 = sadd.s32 1, %s1415_s13  ;;  %p1089_p0 = scmp.ge.s32.totalorder %s1419_s14, 1  ;;  %s1419_s14 = sphi %s1445_s14, %s13_s14   ;;  %s1415_s13 = sphi %s1443_s13, %s1584_s13   ;;  %s1411_s12 = sphi %s1441_s12, %s1583_s12  }
   0x3   : > { %p34_p1 = scmp.ge.s32.totalorder %s32_s15, 2  ;;  %p188_p2 = scmp.lt.s32.totalorder %s1419_s14, 3 }
   0x5   : > { %s1586_s15 = smov (%p34_p1, %s32_s15), 0  ;;  %p189_p3 = pnand %p1089_p0, %p188_p2 }
   0x6   : > { %v1378_v0 = vld [vmem:[%s1580_s1] sm:$0xff] (!%p189_p3)   ;;  %s1090_s18 = sshll.u32 (!%p189_p3), %s1411_s12, 5  ;;  %v1379_v1 = vld [vmem:[%s1580_s1 + $0x8] sm:$0xff] (!%p189_p3)   ;;  %v1380_v2 = vld [vmem:[%s1580_s1 + $0x10] sm:$0xff] (!%p189_p3)   ;;  %vm464_vm0 = vcmask (!%p189_p3), 392192  }
   0x7   : > { %192 = sbr.rel (%p189_p3) target bundleno = 264 (0x108), region = 32  ;;  %p230_p4 = scmp.lt.s32.totalorder (!%p189_p3), %s1090_s18, 63  ;;  %1310 = vmatprep.subr.bf16.mxu0 (!%p189_p3), %v1378_v0  ;;  %1348 = vmatprep.subr.bf16.mxu1 (!%p189_p3), %v1378_v0  ;;  %v1513_v20 = vld [vmem:[%s1581_s2] ss:$0 sm:$0xff] (!%p189_p3) }
   0x8   : > { %1311 = vmatpush3.bf16.msra.mxu0 (!%p189_p3), %v1378_v0  ;;  %1351 = vmatpush3.bf16.msra.mxu1 (!%p189_p3), %v1378_v0 }
   0x9   : > { %1312 = vmatprep.subr.bf16.mxu0 (!%p189_p3), %v1379_v1  ;;  %1349 = vmatprep.subr.bf16.mxu1 (!%p189_p3), %v1379_v1 }
   0xc   : > { %1313 = vmatpush3.bf16.msra.mxu0 (!%p189_p3), %v1379_v1  ;;  %1352 = vmatpush3.bf16.msra.mxu1 (!%p189_p3), %v1379_v1 }
   0xd   : > { %1314 = vmatprep.subr.bf16.mxu0 (!%p189_p3), %v1380_v2  ;;  %1350 = vmatprep.subr.bf16.mxu1 (!%p189_p3), %v1380_v2 }
   0xe   : > { %s1588_s18 = smov (!%p230_p4, %s1090_s18), 63 }
   0xf   : > { %s1091_s23 = sshll.u32 %s1588_s18, 2 }
  0x10   : > { %s1476_s26 = scalar_lea.vmem %s1579_s0, %s1091_s23  ;;  %1315 = vmatpush3.bf16.msra.mxu0 %v1380_v2  ;;  %1353 = vmatpush3.bf16.msra.mxu1 %v1380_v2  ;;  %s1526_s4 = scalar_lea.vmem %s1582_s3, %s1091_s23 }
  0x11   : > { %v1381_v3 = vld [vmem:[%s1476_s26] sm:$0xff]   ;;  %v1383_v5 = vld [vmem:[%s1476_s26 + $0x8] sm:$0xff]   ;;  %v1385_v7 = vld [vmem:[%s1476_s26 + $0x10] sm:$0xff]  }
  0x12   : > { %v1382_v4 = vld [vmem:[%s1476_s26 + $0x40] sm:$0xff]   ;;  %1316 = vmatprep.mubr.msk.bf16.mxu0 %vm464_vm0, %v1381_v3  ;;  %v1384_v6 = vld [vmem:[%s1476_s26 + $0x48] sm:$0xff]   ;;  %v1386_v8 = vld [vmem:[%s1476_s26 + $0x50] sm:$0xff]  }
  0x13   : > { %1332 = vmatprep.mubr.msk.bf16.mxu1 %vm464_vm0, %v1382_v4  ;;  %1317 = vmatmul.mubr.msk.bf16.vlgmr.msra.gmra.mrb[0].mxu0 %vm464_vm0, %v1383_v5  ;;  %v1387_v9 = vld [vmem:[%s1476_s26 + $0x18] sm:$0xff]   ;;  %v1389_v11 = vld [vmem:[%s1476_s26 + $0x20] sm:$0xff]   ;;  %v1391_v13 = vld [vmem:[%s1476_s26 + $0x28] sm:$0xff]  }
  0x14   : > { %1333 = vmatmul.mubr.msk.bf16.vlgmr.msra.gmra.mrb[0].mxu1 %vm464_vm0, %v1384_v6  ;;  %1320 = vmatprep.mubr.msk.bf16.mxu0 %vm464_vm0, %v1385_v7  ;;  %v1388_v10 = vld [vmem:[%s1476_s26 + $0x58] sm:$0xff]   ;;  %v1390_v12 = vld [vmem:[%s1476_s26 + $0x60] sm:$0xff]   ;;  %v1392_v14 = vld [vmem:[%s1476_s26 + $0x68] sm:$0xff]  }
  0x15   : > { %1336 = vmatprep.mubr.msk.bf16.mxu1 %vm464_vm0, %v1386_v8  ;;  %v1393_v15 = vld [vmem:[%s1476_s26 + $0x30] sm:$0xff]   ;;  %v1395_v17 = vld [vmem:[%s1476_s26 + $0x38] sm:$0xff]  }
  0x16   : > { %v1394_v16 = vld [vmem:[%s1476_s26 + $0x70] sm:$0xff]   ;;  %v1396_v18 = vld [vmem:[%s1476_s26 + $0x78] sm:$0xff]  }
  0x1b   : > { %1321 = vmatmul.mubr.msk.bf16.gmra.mrb[4].mxu0 %vm464_vm0, %v1387_v9 }
  0x1c   : > { %1337 = vmatmul.mubr.msk.bf16.gmra.mrb[4].mxu1 %vm464_vm0, %v1388_v10  ;;  %1324 = vmatprep.mubr.msk.bf16.mxu0 %vm464_vm0, %v1389_v11 }
  0x1d   : > { %1340 = vmatprep.mubr.msk.bf16.mxu1 %vm464_vm0, %v1390_v12 }
  0x23   : > { %1325 = vmatmul.mubr.msk.bf16.gmra.mrb[8].mxu0 %vm464_vm0, %v1391_v13 }
  0x24   : > { %1341 = vmatmul.mubr.msk.bf16.gmra.mrb[8].mxu1 %vm464_vm0, %v1392_v14  ;;  %1328 = vmatprep.mubr.msk.bf16.mxu0 %vm464_vm0, %v1393_v15 }
  0x25   : > { %1344 = vmatprep.mubr.msk.bf16.mxu1 %vm464_vm0, %v1394_v16 }
  0x2b   : > { %1329 = vmatmul.mubr.msk.bf16.gmra.mrb[12].mxu0 %vm464_vm0, %v1395_v17 }
  0x2c   : > { %1345 = vmatmul.mubr.msk.bf16.gmra.mrb[12].mxu1 %vm464_vm0, %v1396_v18 }
  0xe6   : > { %v1318_v19 = vpop.f32.mrb[0].mxu0 }
  0xe7   : > { %v1334_v21 = vpop.f32.mrb[0].mxu1  ;;  %v547_v22 = vpop.f32.mrb[1].mxu0  ;;  %v782_v26 = vadd.f32 %v1318_v19, %v1513_v20 }
  0xe8   : > { %v611_v23 = vpop.f32.mrb[1].mxu1  ;;  %v1319_v24 = vpop.f32.mrb[2].mxu0  ;;  %v798_v27 = vadd.f32 %v1334_v21, %v1513_v20  ;;  %v780_v32 = vadd.f32 %v1513_v20, %v547_v22 }
  0xe9   : > { %v1335_v25 = vpop.f32.mrb[2].mxu1  ;;  %v783_v28 = vadd.f32 %v1319_v24, %v1513_v20  ;;  %v550_v30 = vpop.f32.mrb[3].mxu0  ;;  %v796_v33 = vadd.f32 %v1513_v20, %v611_v23 }
  0xea   : > { %v799_v29 = vadd.f32 %v1335_v25, %v1513_v20  ;;  %v614_v31 = vpop.f32.mrb[3].mxu1  ;;  %v781_v34 = vadd.f32 %v1513_v20, %v550_v30 }
  0xeb   : > { %v797_v35 = vadd.f32 %v1513_v20, %v614_v31  ;;  %v1204_v36 = vpack.c.bf16 %v783_v28, %v782_v26 }
  0xec   : > { %v1244_v37 = vpack.c.bf16 %v799_v29, %v798_v27  ;;  %v1199_v38 = vpack.c.bf16 %v781_v34, %v780_v32 }
  0xed   : > { %v1239_v39 = vpack.c.bf16 %v797_v35, %v796_v33  ;;  %1276 = vst [vmem:[%s1526_s4 + $0x8] sm:$0xff] %v1204_v36  }
  0xee   : > { %1284 = vst [vmem:[%s1526_s4 + $0x48] sm:$0xff] %v1244_v37   ;;  %1200 = vst [vmem:[%s1526_s4] sm:$0xff] %v1199_v38   ;;  %v1322_v40 = vpop.f32.mrb[4].mxu0 }
  0xef   : > { %1283 = vst [vmem:[%s1526_s4 + $0x40] sm:$0xff] %v1239_v39   ;;  %v1338_v41 = vpop.f32.mrb[4].mxu1  ;;  %v563_v42 = vpop.f32.mrb[5].mxu0  ;;  %v786_v46 = vadd.f32 %v1322_v40, %v1513_v20 }
  0xf0   : > { %v627_v43 = vpop.f32.mrb[5].mxu1  ;;  %v1323_v44 = vpop.f32.mrb[6].mxu0  ;;  %v802_v47 = vadd.f32 %v1338_v41, %v1513_v20  ;;  %v784_v52 = vadd.f32 %v1513_v20, %v563_v42 }
  0xf1   : > { %v1339_v45 = vpop.f32.mrb[6].mxu1  ;;  %v787_v48 = vadd.f32 %v1323_v44, %v1513_v20  ;;  %v566_v50 = vpop.f32.mrb[7].mxu0  ;;  %v800_v53 = vadd.f32 %v1513_v20, %v627_v43 }
  0xf2   : > { %v803_v49 = vadd.f32 %v1339_v45, %v1513_v20  ;;  %v630_v51 = vpop.f32.mrb[7].mxu1  ;;  %v785_v54 = vadd.f32 %v1513_v20, %v566_v50 }
  0xf3   : > { %v801_v55 = vadd.f32 %v1513_v20, %v630_v51  ;;  %v1214_v56 = vpack.c.bf16 %v787_v48, %v786_v46 }
  0xf4   : > { %v1254_v57 = vpack.c.bf16 %v803_v49, %v802_v47  ;;  %v1209_v58 = vpack.c.bf16 %v785_v54, %v784_v52 }
  0xf5   : > { %v1249_v59 = vpack.c.bf16 %v801_v55, %v800_v53  ;;  %1278 = vst [vmem:[%s1526_s4 + $0x18] sm:$0xff] %v1214_v56  }
  0xf6   : > { %1286 = vst [vmem:[%s1526_s4 + $0x58] sm:$0xff] %v1254_v57   ;;  %1277 = vst [vmem:[%s1526_s4 + $0x10] sm:$0xff] %v1209_v58   ;;  %v1326_v60 = vpop.f32.mrb[8].mxu0 }
  0xf7   : > { %1285 = vst [vmem:[%s1526_s4 + $0x50] sm:$0xff] %v1249_v59   ;;  %v1342_v61 = vpop.f32.mrb[8].mxu1  ;;  %v579_v62 = vpop.f32.mrb[9].mxu0  ;;  %v790_v2 = vadd.f32 %v1326_v60, %v1513_v20 }
  0xf8   : > { %v643_v63 = vpop.f32.mrb[9].mxu1  ;;  %v1327_v0 = vpop.f32.mrb[10].mxu0  ;;  %v806_v3 = vadd.f32 %v1342_v61, %v1513_v20  ;;  %v788_v8 = vadd.f32 %v1513_v20, %v579_v62 }
  0xf9   : > { %v1343_v1 = vpop.f32.mrb[10].mxu1  ;;  %v791_v4 = vadd.f32 %v1327_v0, %v1513_v20  ;;  %v582_v6 = vpop.f32.mrb[11].mxu0  ;;  %v804_v9 = vadd.f32 %v1513_v20, %v643_v63 }
  0xfa   : > { %v807_v5 = vadd.f32 %v1343_v1, %v1513_v20  ;;  %v646_v7 = vpop.f32.mrb[11].mxu1  ;;  %v789_v10 = vadd.f32 %v1513_v20, %v582_v6 }
  0xfb   : > { %v805_v11 = vadd.f32 %v1513_v20, %v646_v7  ;;  %v1224_v12 = vpack.c.bf16 %v791_v4, %v790_v2 }
  0xfc   : > { %v1264_v13 = vpack.c.bf16 %v807_v5, %v806_v3  ;;  %v1219_v14 = vpack.c.bf16 %v789_v10, %v788_v8 }
  0xfd   : > { %v1259_v15 = vpack.c.bf16 %v805_v11, %v804_v9  ;;  %1280 = vst [vmem:[%s1526_s4 + $0x28] sm:$0xff] %v1224_v12  }
  0xfe   : > { %1288 = vst [vmem:[%s1526_s4 + $0x68] sm:$0xff] %v1264_v13   ;;  %1279 = vst [vmem:[%s1526_s4 + $0x20] sm:$0xff] %v1219_v14   ;;  %v1330_v16 = vpop.f32.mrb[12].mxu0 }
  0xff   : > { %1287 = vst [vmem:[%s1526_s4 + $0x60] sm:$0xff] %v1259_v15   ;;  %v1346_v17 = vpop.f32.mrb[12].mxu1  ;;  %v595_v18 = vpop.f32.mrb[13].mxu0  ;;  %v794_v23 = vadd.f32 %v1330_v16, %v1513_v20 }
 0x100   : > { %v659_v19 = vpop.f32.mrb[13].mxu1  ;;  %v1331_v21 = vpop.f32.mrb[14].mxu0  ;;  %v810_v24 = vadd.f32 %v1346_v17, %v1513_v20  ;;  %v792_v29 = vadd.f32 %v1513_v20, %v595_v18 }
 0x101   : > { %v1347_v22 = vpop.f32.mrb[14].mxu1  ;;  %v795_v25 = vadd.f32 %v1331_v21, %v1513_v20  ;;  %v598_v27 = vpop.f32.mrb[15].mxu0  ;;  %v808_v30 = vadd.f32 %v1513_v20, %v659_v19 }
 0x102   : > { %v811_v26 = vadd.f32 %v1347_v22, %v1513_v20  ;;  %v662_v28 = vpop.f32.mrb[15].mxu1  ;;  %v793_v31 = vadd.f32 %v1513_v20, %v598_v27 }
 0x103   : > { %v809_v32 = vadd.f32 %v1513_v20, %v662_v28  ;;  %v1234_v33 = vpack.c.bf16 %v795_v25, %v794_v23 }
 0x104   : > { %v1274_v34 = vpack.c.bf16 %v811_v26, %v810_v24  ;;  %v1229_v35 = vpack.c.bf16 %v793_v31, %v792_v29 }
 0x105   : > { %v1269_v36 = vpack.c.bf16 %v809_v32, %v808_v30  ;;  %1282 = vst [vmem:[%s1526_s4 + $0x38] sm:$0xff] %v1234_v33  }
 0x106   : > { %1290 = vst [vmem:[%s1526_s4 + $0x78] sm:$0xff] %v1274_v34   ;;  %1281 = vst [vmem:[%s1526_s4 + $0x30] sm:$0xff] %v1229_v35  }
 0x107   : > { %1289 = vst [vmem:[%s1526_s4 + $0x70] sm:$0xff] %v1269_v36  }
 0x108 PF: > { %s13_s14 = sadd.s32 1, %s1419_s14   ;;  %s1583_s12 = smov %s1415_s13 }
 0x109   : > { %p10_p5 = scmp.ge.s32.totalorder %s13_s14, 4   ;;  %s1584_s13 = smov %s1586_s15 }
 0x10b   :  { %12 = sbr.rel (!%p10_p5) target bundleno = 2 (0x2), region = 76 }

// kernel: fwd.26
= control target key start
LH: loop header
LB: loop body
LE: loop exit
PB: predicated region body
PF: predicated region fallthrough
CT: control target
= control target key end

     0   :  { %s705_s1 = inlined_call_operand.vmem [shape: bf16[128,128], index: 1, kind: input, shape index: {}]   ;;  %s706_s0 = inlined_call_operand.vmem [shape: bf16[128,128], index: 0, kind: input, shape index: {}]   ;;  %s707_s2 = inlined_call_operand.vmem [shape: f32[1,128], index: 2, kind: input, shape index: {}]   ;;  %s708_s3 = inlined_call_operand.vmem [shape: bf16[128,128], index: 3, kind: output, shape index: {}]  }
   0x1   :  { %v594_v0 = vld [vmem:[%s705_s1] sm:$0xff]   ;;  %v595_v1 = vld [vmem:[%s705_s1 + $0x8] sm:$0xff]   ;;  %v596_v2 = vld [vmem:[%s705_s1 + $0x10] sm:$0xff]  }
   0x2   :  { %546 = vmatprep.subr.bf16.mxu0 %v594_v0  ;;  %578 = vmatprep.subr.bf16.mxu1 %v594_v0  ;;  %v597_v3 = vld [vmem:[%s705_s1 + $0x18] sm:$0xff]   ;;  %v602_v4 = vld [vmem:[%s706_s0] sm:$0xff]   ;;  %v599_v7 = vld [vmem:[%s705_s1 + $0x28] sm:$0xff]  }
   0x3   :  { %547 = vmatpush3.bf16.msra.mxu0 %v594_v0  ;;  %586 = vmatpush3.bf16.msra.mxu1 %v594_v0  ;;  %v603_v5 = vld [vmem:[%s706_s0 + $0x20] sm:$0xff]   ;;  %v600_v8 = vld [vmem:[%s705_s1 + $0x30] sm:$0xff]   ;;  %v601_v9 = vld [vmem:[%s705_s1 + $0x38] sm:$0xff]  }
   0x4   :  { %548 = vmatprep.subr.bf16.mxu0 %v595_v1  ;;  %579 = vmatprep.subr.bf16.mxu1 %v595_v1  ;;  %v598_v6 = vld [vmem:[%s705_s1 + $0x20] sm:$0xff]   ;;  %v604_v10 = vld [vmem:[%s706_s0 + $0x8] sm:$0xff]   ;;  %v606_v12 = vld [vmem:[%s706_s0 + $0x10] sm:$0xff]  }
   0x5   :  { %562 = vmatprep.mubr.bf16.mxu0 %v602_v4  ;;  %570 = vmatprep.mubr.bf16.mxu1 %v603_v5  ;;  %v605_v11 = vld [vmem:[%s706_s0 + $0x28] sm:$0xff]   ;;  %v607_v13 = vld [vmem:[%s706_s0 + $0x30] sm:$0xff]   ;;  %v608_v14 = vld [vmem:[%s706_s0 + $0x18] sm:$0xff]  }
   0x6   :  { %v609_v15 = vld [vmem:[%s706_s0 + $0x38] sm:$0xff]   ;;  %v450_v17 = vld [vmem:[%s707_s2] ss:$0 sm:$0xff] }
   0x7   :  { %549 = vmatpush3.bf16.msra.mxu0 %v595_v1  ;;  %587 = vmatpush3.bf16.msra.mxu1 %v595_v1 }
   0x8   :  { %550 = vmatprep.subr.bf16.mxu0 %v596_v2  ;;  %580 = vmatprep.subr.bf16.mxu1 %v596_v2 }
   0xb   :  { %551 = vmatpush3.bf16.msra.mxu0 %v596_v2  ;;  %588 = vmatpush3.bf16.msra.mxu1 %v596_v2 }
   0xc   :  { %552 = vmatprep.subr.bf16.mxu0 %v597_v3  ;;  %581 = vmatprep.subr.bf16.mxu1 %v597_v3 }
   0xf   :  { %553 = vmatpush3.bf16.msra.mxu0 %v597_v3  ;;  %589 = vmatpush3.bf16.msra.mxu1 %v597_v3 }
  0x10   :  { %554 = vmatprep.subr.bf16.mxu0 %v598_v6  ;;  %582 = vmatprep.subr.bf16.mxu1 %v598_v6 }
  0x13   :  { %555 = vmatpush3.bf16.msra.mxu0 %v598_v6  ;;  %590 = vmatpush3.bf16.msra.mxu1 %v598_v6 }
  0x14   :  { %556 = vmatprep.subr.bf16.mxu0 %v599_v7  ;;  %583 = vmatprep.subr.bf16.mxu1 %v599_v7 }
  0x17   :  { %557 = vmatpush3.bf16.msra.mxu0 %v599_v7  ;;  %591 = vmatpush3.bf16.msra.mxu1 %v599_v7 }
  0x18   :  { %558 = vmatprep.subr.bf16.mxu0 %v600_v8  ;;  %584 = vmatprep.subr.bf16.mxu1 %v600_v8 }
  0x1b   :  { %559 = vmatpush3.bf16.msra.mxu0 %v600_v8  ;;  %592 = vmatpush3.bf16.msra.mxu1 %v600_v8 }
  0x1c   :  { %560 = vmatprep.subr.bf16.mxu0 %v601_v9  ;;  %585 = vmatprep.subr.bf16.mxu1 %v601_v9 }
  0x1f   :  { %561 = vmatpush3.bf16.msra.mxu0 %v601_v9  ;;  %593 = vmatpush3.bf16.msra.mxu1 %v601_v9 }
  0x22   :  { %563 = vmatmul.mubr.bf16.vlgmr.msra.gmra.mrb[0].mxu0 %v604_v10  ;;  %571 = vmatmul.mubr.bf16.vlgmr.msra.gmra.mrb[0].mxu1 %v605_v11 }
  0x23   :  { %566 = vmatprep.mubr.bf16.mxu0 %v606_v12  ;;  %574 = vmatprep.mubr.bf16.mxu1 %v607_v13 }
  0x2a   :  { %567 = vmatmul.mubr.bf16.gmra.mrb[4].mxu0 %v608_v14  ;;  %575 = vmatmul.mubr.bf16.gmra.mrb[4].mxu1 %v609_v15 }
  0xf5   :  { %v564_v16 = vpop.f32.mrb[0].mxu0  ;;  %v572_v18 = vpop.f32.mrb[0].mxu1 }
  0xf6   :  { %v213_v19 = vpop.f32.mrb[1].mxu0  ;;  %v245_v20 = vpop.f32.mrb[1].mxu1  ;;  %v336_v23 = vadd.f32 %v564_v16, %v450_v17  ;;  %v344_v24 = vadd.f32 %v572_v18, %v450_v17 }
  0xf7   :  { %v565_v21 = vpop.f32.mrb[2].mxu0  ;;  %v573_v22 = vpop.f32.mrb[2].mxu1  ;;  %v334_v29 = vadd.f32 %v450_v17, %v213_v19  ;;  %v342_v30 = vadd.f32 %v450_v17, %v245_v20 }
  0xf8   :  { %v337_v25 = vadd.f32 %v565_v21, %v450_v17  ;;  %v345_v26 = vadd.f32 %v573_v22, %v450_v17  ;;  %v216_v27 = vpop.f32.mrb[3].mxu0  ;;  %v248_v28 = vpop.f32.mrb[3].mxu1 }
  0xf9   :  { %v335_v31 = vadd.f32 %v450_v17, %v216_v27  ;;  %v343_v32 = vadd.f32 %v450_v17, %v248_v28 }
  0xfa   :  { %v491_v33 = vpack.c.bf16 %v337_v25, %v336_v23  ;;  %v511_v34 = vpack.c.bf16 %v345_v26, %v344_v24 }
  0xfb   :  { %v486_v35 = vpack.c.bf16 %v335_v31, %v334_v29  ;;  %v506_v36 = vpack.c.bf16 %v343_v32, %v342_v30 }
  0xfc   :  { %523 = vst [vmem:[%s708_s3 + $0x8] sm:$0xff] %v491_v33   ;;  %527 = vst [vmem:[%s708_s3 + $0x28] sm:$0xff] %v511_v34  }
  0xfd   :  { %487 = vst [vmem:[%s708_s3] sm:$0xff] %v486_v35   ;;  %526 = vst [vmem:[%s708_s3 + $0x20] sm:$0xff] %v506_v36   ;;  %v568_v37 = vpop.f32.mrb[4].mxu0  ;;  %v576_v38 = vpop.f32.mrb[4].mxu1 }
  0xfe   :  { %v229_v39 = vpop.f32.mrb[5].mxu0  ;;  %v261_v40 = vpop.f32.mrb[5].mxu1  ;;  %v340_v43 = vadd.f32 %v568_v37, %v450_v17  ;;  %v348_v44 = vadd.f32 %v576_v38, %v450_v17 }
  0xff   :  { %v569_v41 = vpop.f32.mrb[6].mxu0  ;;  %v577_v42 = vpop.f32.mrb[6].mxu1  ;;  %v338_v49 = vadd.f32 %v450_v17, %v229_v39  ;;  %v346_v50 = vadd.f32 %v450_v17, %v261_v40 }
 0x100   :  { %v341_v45 = vadd.f32 %v569_v41, %v450_v17  ;;  %v349_v46 = vadd.f32 %v577_v42, %v450_v17  ;;  %v232_v47 = vpop.f32.mrb[7].mxu0  ;;  %v264_v48 = vpop.f32.mrb[7].mxu1 }
 0x101   :  { %v339_v51 = vadd.f32 %v450_v17, %v232_v47  ;;  %v347_v52 = vadd.f32 %v450_v17, %v264_v48 }
 0x102   :  { %v501_v53 = vpack.c.bf16 %v341_v45, %v340_v43  ;;  %v521_v54 = vpack.c.bf16 %v349_v46, %v348_v44 }
 0x103   :  { %v496_v55 = vpack.c.bf16 %v339_v51, %v338_v49  ;;  %v516_v56 = vpack.c.bf16 %v347_v52, %v346_v50 }
 0x104   :  { %525 = vst [vmem:[%s708_s3 + $0x18] sm:$0xff] %v501_v53   ;;  %529 = vst [vmem:[%s708_s3 + $0x38] sm:$0xff] %v521_v54  }
 0x105   :  { %524 = vst [vmem:[%s708_s3 + $0x10] sm:$0xff] %v496_v55   ;;  %528 = vst [vmem:[%s708_s3 + $0x30] sm:$0xff] %v516_v56  }

// kernel: fwd.27
= control target key start
LH: loop header
LB: loop body
LE: loop exit
PB: predicated region body
PF: predicated region fallthrough
CT: control target
= control target key end

     0   :  { %s792_s12 = smov 0   ;;  %s794_s13 = smov 0   ;;  %s885_s0 = inlined_call_operand.vmem [shape: bf16[32,256], index: 0, kind: input, shape index: {}]   ;;  %s886_s1 = inlined_call_operand.vmem [shape: bf16[256,128], index: 1, kind: input, shape index: {}]   ;;  %s887_s2 = inlined_call_operand.vmem [shape: f32[1,128], index: 2, kind: input, shape index: {}]   ;;  %s888_s3 = inlined_call_operand.vmem [shape: bf16[32,128], index: 3, kind: output, shape index: {}]  }
   0x1   :  { %s796_s14 = smov 0   ;;  %s798_s15 = smov 0  }
   0x2   :  { %s800_s16 = smov 0  }
   0x3 LB: > { %s25_s17 = sadd.s32 1, %s765_s15  ;;  %p48_p1 = scmp.ne.s32.totalorder %s757_s13, %s753_s12  ;;  %s769_s16 = sphi %s800_s16, %s13_s16   ;;  %s765_s15 = sphi %s798_s15, %s892_s15   ;;  %s761_s14 = sphi %s796_s14, %s891_s14   ;;  %s757_s13 = sphi %s794_s13, %s890_s13   ;;  %s753_s12 = sphi %s792_s12, %s889_s12  }
   0x4   : > { %p26_p0 = scmp.ge.s32.totalorder %s25_s17, 2  ;;  %p49_p2 = scmp.eq.s32.totalorder %s769_s16, 0 }
   0x5   : > { %s41_s19 = sadd.s32 1, %s757_s13  ;;  %p607_p5 = scmp.ge.s32.totalorder %s769_s16, 2 }
   0x6   : > { %s894_s17 = smov (%p26_p0, %s25_s17), 0  ;;  %p50_p3 = por %p49_p2, %p48_p1 }
   0x7   : > { %s37_s18 = ssub.s32 %s765_s15, %s894_s17  ;;  %162 = sbr.rel (%p607_p5) target bundleno = 21 (0x15), region = 20 }
   0x8   : > { %p39_p4 = scmp.eq.s32.totalorder %s37_s18, 0 }
   0xa   : > { %s827_s20 = scalar_select %p39_p4, %s757_s13, %s41_s19  }
   0xe   : > { %165 = sbr.rel (!%p50_p3) target bundleno = 21 (0x15), region = 24  ;;  %s167_s21 = sand.u32 (%p50_p3), 1, %s757_s13  }
   0xf   : > { %s609_s22 = sshll.u32 (%p50_p3), %s765_s15, 2  ;;  %s608_s23 = sshll.u32 (%p50_p3), %s167_s21, 4 }
  0x10   : > { %s174_s26 = scalar_lea.vmem (%p50_p3), %s885_s0, %s609_s22  ;;  %s169_s27 = scalar_lea.vmem (%p50_p3), [#allocation3], %s608_s23 }
  0x11   : > { %v190_v0 = vld [vmem:[%s174_s26] sm:$0xf] (%p50_p3)  ;;  %v192_v1 = vld [vmem:[%s174_s26 + $0x8] sm:$0xf] (%p50_p3)  ;;  %v194_v2 = vld [vmem:[%s174_s26 + $0x10] sm:$0xf] (%p50_p3) }
  0x12   : > { %191 = vst [vmem:[%s169_s27] sm:$0xf] (%p50_p3), %v190_v0  ;;  %193 = vst [vmem:[%s169_s27 + $0x4] sm:$0xf] (%p50_p3), %v192_v1  ;;  %v196_v3 = vld [vmem:[%s174_s26 + $0x18] sm:$0xf] (%p50_p3) }
  0x13   : > { %195 = vst [vmem:[%s169_s27 + $0x8] sm:$0xf] (%p50_p3), %v194_v2  ;;  %197 = vst [vmem:[%s169_s27 + $0xc] sm:$0xf] (%p50_p3), %v196_v3 }
  0x15 PF: > { %p610_p6 = scmp.ge.s32.totalorder %s769_s16, 1  ;;  %p239_p7 = scmp.lt.s32.totalorder %s769_s16, 3 }
  0x17   : > { %p240_p8 = pnand %p610_p6, %p239_p7 }
  0x18   : > { %s246_s28 = sand.u32 (!%p240_p8), 1, %s753_s12   ;;  %s612_s29 = sshll.u32 (!%p240_p8), %s761_s14, 4 }
  0x19   : > { %243 = sbr.rel (%p240_p8) target bundleno = 302 (0x12e), region = 69  ;;  %s839_s30 = sshll.u32 (!%p240_p8), %s246_s28, 4 }
  0x1a   : > { %p285_p9 = scmp.lt.s32.totalorder (!%p240_p8), %s612_s29, 31  ;;  %s248_s8 = scalar_lea.vmem (!%p240_p8), [#allocation3], %s839_s30 }
  0x1b   : > { %p614_p10 = scmp.ne.s32.totalorder (!%p240_p8), %s761_s14, 0 }
  0x20   : > { %s896_s29 = smov (!%p285_p9, %s612_s29), 31  ;;  %309 = sbr.rel (%p614_p10) target bundleno = 39 (0x27), region = 77 }
  0x21   : > { %s613_s4 = sshll.u32 %s896_s29, 2  ;;  %v771_v4 = vmov (!%p614_p10), 0.0  }
  0x22   : > { %s844_s7 = scalar_lea.vmem %s886_s1, %s613_s4  ;;  %310 = vst [vmem:[#allocation2] sm:$0xff] (!%p614_p10), %v771_v4  ;;  %311 = vst [vmem:[#allocation2 + $0x8] sm:$0xff] (!%p614_p10), %v771_v4 }
  0x23   : > { %312 = vst [vmem:[#allocation2 + $0x10] sm:$0xff] (!%p614_p10), %v771_v4  ;;  %313 = vst [vmem:[#allocation2 + $0x18] sm:$0xff] (!%p614_p10), %v771_v4 }
  0x27 PF: > { %v721_v5 = vld [vmem:[%s844_s7] sm:$0xff]   ;;  %v722_v6 = vld [vmem:[%s844_s7 + $0x8] sm:$0xff]   ;;  %v723_v7 = vld [vmem:[%s844_s7 + $0x10] sm:$0xff]   ;;  %p625_p11 = scmp.ne.s32.totalorder %s761_s14, 1 }
  0x28   : > { %660 = vmatprep.subr.bf16.mxu0 %v721_v5  ;;  %v724_v8 = vld [vmem:[%s844_s7 + $0x18] sm:$0xff]   ;;  %v729_v9 = vld [vmem:[%s248_s8] sm:$0xff]   ;;  %v726_v11 = vld [vmem:[%s844_s7 + $0x28] sm:$0xff]  }
  0x29   : > { %661 = vmatpush3.bf16.msra.mxu0 %v721_v5  ;;  %676 = vmatprep.mubr.bf16.mxu0 %v729_v9  ;;  %v725_v10 = vld [vmem:[%s844_s7 + $0x20] sm:$0xff]   ;;  %v727_v12 = vld [vmem:[%s844_s7 + $0x30] sm:$0xff]   ;;  %v728_v13 = vld [vmem:[%s844_s7 + $0x38] sm:$0xff]  }
  0x2a   : > { %662 = vmatprep.subr.bf16.mxu0 %v722_v6  ;;  %v730_v14 = vld [vmem:[%s248_s8 + $0x8] sm:$0xff]   ;;  %v316_v15 = vld [vmem:[#allocation2 + $0x10] sm:$0xff]  ;;  %v314_v16 = vld [vmem:[#allocation2] sm:$0xff] }
  0x2b   : > { %v317_v18 = vld [vmem:[#allocation2 + $0x18] sm:$0xff]  ;;  %v315_v21 = vld [vmem:[#allocation2 + $0x8] sm:$0xff]  ;;  %v626_v29 = vld [vmem:[%s887_s2] ss:$0 sm:$0xff] (!%p625_p11) }
  0x2d   : > { %663 = vmatpush3.bf16.msra.mxu0 %v722_v6 }
  0x2e   : > { %664 = vmatprep.subr.bf16.mxu0 %v723_v7 }
  0x31   : > { %665 = vmatpush3.bf16.msra.mxu0 %v723_v7 }
  0x32   : > { %666 = vmatprep.subr.bf16.mxu0 %v724_v8 }
  0x35   : > { %667 = vmatpush3.bf16.msra.mxu0 %v724_v8 }
  0x36   : > { %668 = vmatprep.subr.bf16.mxu0 %v725_v10 }
  0x39   : > { %669 = vmatpush3.bf16.msra.mxu0 %v725_v10 }
  0x3a   : > { %670 = vmatprep.subr.bf16.mxu0 %v726_v11 }
  0x3d   : > { %671 = vmatpush3.bf16.msra.mxu0 %v726_v11 }
  0x3e   : > { %672 = vmatprep.subr.bf16.mxu0 %v727_v12 }
  0x41   : > { %673 = vmatpush3.bf16.msra.mxu0 %v727_v12 }
  0x42   : > { %674 = vmatprep.subr.bf16.mxu0 %v728_v13 }
  0x45   : > { %675 = vmatpush3.bf16.msra.mxu0 %v728_v13 }
  0x48   : > { %677 = vmatmul.mubr.bf16.vlgmr.msra.gmra.mrb[0].mxu0 %v730_v14 }
 0x11b   : > { %v678_v17 = vpop.f32.mrb[0].mxu0  ;;  %458 = sbr.rel (%p625_p11) target bundleno = 302 (0x12e), region = 81 }
 0x11c   : > { %v449_v19 = vadd.f32 %v678_v17, %v316_v15  ;;  %v432_v20 = vpop.f32.mrb[1].mxu0 }
 0x11d   : > { %v447_v22 = vadd.f32 %v432_v20, %v314_v16  ;;  %v679_v23 = vpop.f32.mrb[2].mxu0 }
 0x11e   : > { %453 = vst [vmem:[#allocation2 + $0x10] sm:$0xff] %v449_v19  ;;  %v450_v24 = vadd.f32 %v679_v23, %v317_v18  ;;  %v435_v25 = vpop.f32.mrb[3].mxu0 }
 0x11f   : > { %451 = vst [vmem:[#allocation2] sm:$0xff] %v447_v22  ;;  %v448_v26 = vadd.f32 %v435_v25, %v315_v21 }
 0x120   : > { %454 = vst [vmem:[#allocation2 + $0x18] sm:$0xff] %v450_v24 }
 0x121   : > { %452 = vst [vmem:[#allocation2 + $0x8] sm:$0xff] %v448_v26 }
 0x125   : > { %v461_v32 = vld [vmem:[#allocation2 + $0x10] sm:$0xff] }
 0x126   : > { %v459_v27 = vld [vmem:[#allocation2] sm:$0xff]  ;;  %v472_v34 = vadd.f32 %v626_v29, %v461_v32 }
 0x127   : > { %v470_v30 = vadd.f32 %v626_v29, %v459_v27  ;;  %v462_v33 = vld [vmem:[#allocation2 + $0x18] sm:$0xff] }
 0x128   : > { %v460_v28 = vld [vmem:[#allocation2 + $0x8] sm:$0xff]  ;;  %v473_v35 = vadd.f32 %v626_v29, %v462_v33 }
 0x129   : > { %v471_v31 = vadd.f32 %v626_v29, %v460_v28 }
 0x12a   : > { %v647_v37 = vpack.c.bf16 %v473_v35, %v472_v34 }
 0x12b   : > { %v642_v36 = vpack.c.bf16 %v471_v31, %v470_v30 }
 0x12c   : > { %649 = vst [vmem:[%s888_s3 + $0x8] sm:$0xff] %v647_v37  }
 0x12d   : > { %643 = vst [vmem:[%s888_s3] sm:$0xff] %v642_v36  }
 0x12e PF: > { %s13_s16 = sadd.s32 1, %s769_s16   ;;  %s889_s12 = smov %s757_s13 }
 0x12f   : > { %p10_p12 = scmp.ge.s32.totalorder %s13_s16, 4   ;;  %s890_s13 = smov %s827_s20 }
 0x130   : > { %s891_s14 = smov %s765_s15  ;;  %s892_s15 = smov %s894_s17 }
 0x131   :  { %12 = sbr.rel (!%p10_p12) target bundleno = 3 (0x3), region = 122 }

// kernel: fwd.28
= control target key start
LH: loop header
LB: loop body
LE: loop exit
PB: predicated region body
PF: predicated region fallthrough
CT: control target
= control target key end

     0   :  { %s707_s12 = smov 0   ;;  %s709_s13 = smov 0   ;;  %s770_s0 = inlined_call_operand.vmem [shape: bf16[8,512], index: 0, kind: input, shape index: {}]   ;;  %s771_s1 = inlined_call_operand.vmem [shape: bf16[512,128], index: 1, kind: input, shape index: {}]   ;;  %s772_s2 = inlined_call_operand.vmem [shape: f32[1,128], index: 2, kind: input, shape index: {}]   ;;  %s773_s3 = inlined_call_operand.vmem [shape: bf16[8,128], index: 3, kind: output, shape index: {}]  }
   0x1   :  { %s711_s14 = smov 0  }
   0x2 LB: > { %s25_s15 = sadd.s32 1, %s680_s13  ;;  %p568_p0 = scmp.ge.s32.totalorder %s684_s14, 1  ;;  %s684_s14 = sphi %s711_s14, %s13_s14   ;;  %s680_s13 = sphi %s709_s13, %s775_s13   ;;  %s676_s12 = sphi %s707_s12, %s774_s12  }
   0x3   : > { %p26_p1 = scmp.ge.s32.totalorder %s25_s15, 2  ;;  %p189_p2 = scmp.lt.s32.totalorder %s684_s14, 3 }
   0x5   : > { %s777_s15 = smov (%p26_p1, %s25_s15), 0  ;;  %p190_p3 = pnand %p568_p0, %p189_p2 }
   0x6   : > { %s569_s16 = sshll.u32 (!%p190_p3), %s676_s12, 1  ;;  %s571_s17 = sshll.u32 (!%p190_p3), %s676_s12, 5 }
   0x7   : > { %193 = sbr.rel (%p190_p3) target bundleno = 287 (0x11f), region = 32  ;;  %p233_p4 = scmp.lt.s32.totalorder (!%p190_p3), %s569_s16, 3 }
   0x8   : > { %p241_p5 = scmp.lt.s32.totalorder (!%p190_p3), %s571_s17, 63  ;;  %p573_p6 = scmp.ne.s32.totalorder (!%p190_p3), %s676_s12, 0 }
   0xe   : > { %s779_s16 = smov (!%p233_p4, %s569_s16), 3  ;;  %s781_s17 = smov (!%p241_p5, %s571_s17), 63 }
   0xf   : > { %s570_s18 = sshll.u32 %s779_s16, 2  ;;  %s572_s22 = sshll.u32 %s781_s17, 2  ;;  %v686_v0 = vmov (!%p573_p6), 0.0  }
  0x10   : > { %s238_s21 = scalar_lea.vmem %s770_s0, %s570_s18  ;;  %s735_s25 = scalar_lea.vmem %s771_s1, %s572_s22  ;;  %264 = vst [vmem:[#allocation2] sm:$0xff] (!%p573_p6), %v686_v0 }
  0x11   : > { %263 = sbr.rel (%p573_p6) target bundleno = 24 (0x18), region = 36 }
  0x18 PF: > { %v644_v1 = vld [vmem:[%s735_s25 + $0x40] sm:$0xff]   ;;  %v646_v3 = vld [vmem:[%s735_s25 + $0x48] sm:$0xff]   ;;  %v648_v5 = vld [vmem:[%s735_s25 + $0x50] sm:$0xff]   ;;  %p592_p7 = scmp.ne.s32.totalorder %s676_s12, 1 }
  0x19   : > { %v645_v2 = vld [vmem:[%s735_s25] sm:$0xff]   ;;  %597 = vmatprep.subr.bf16.mxu0 %v644_v1  ;;  %v647_v4 = vld [vmem:[%s735_s25 + $0x8] sm:$0xff]   ;;  %v649_v6 = vld [vmem:[%s735_s25 + $0x10] sm:$0xff]  }
  0x1a   : > { %598 = vmatpush3.bf16.msra.mxu0 %v645_v2  ;;  %v650_v7 = vld [vmem:[%s735_s25 + $0x58] sm:$0xff]   ;;  %v652_v9 = vld [vmem:[%s735_s25 + $0x60] sm:$0xff]   ;;  %v654_v11 = vld [vmem:[%s735_s25 + $0x68] sm:$0xff]  }
  0x1b   : > { %599 = vmatprep.subr.bf16.mxu0 %v646_v3  ;;  %v651_v8 = vld [vmem:[%s735_s25 + $0x18] sm:$0xff]   ;;  %v653_v10 = vld [vmem:[%s735_s25 + $0x20] sm:$0xff]   ;;  %v655_v14 = vld [vmem:[%s735_s25 + $0x28] sm:$0xff]  }
  0x1c   : > { %v266_v12 = vld [vmem:[%s238_s21] sm:$0xff]  ;;  %v656_v15 = vld [vmem:[%s735_s25 + $0x70] sm:$0xff]   ;;  %v658_v17 = vld [vmem:[%s735_s25 + $0x78] sm:$0xff]  }
  0x1d   : > { %v575_v13 = vcombine.high %v266_v12, %v266_v12  ;;  %v657_v16 = vld [vmem:[%s735_s25 + $0x30] sm:$0xff]   ;;  %v659_v18 = vld [vmem:[%s735_s25 + $0x38] sm:$0xff]   ;;  %v574_v19 = vcombine.low %v266_v12, %v266_v12  ;;  %v265_v21 = vld [vmem:[#allocation2] sm:$0xff] }
  0x1e   : > { %600 = vmatpush3.bf16.msra.mxu0 %v647_v4  ;;  %v593_v28 = vld [vmem:[%s772_s2] ss:$0 sm:$0xff] (!%p592_p7) }
  0x1f   : > { %601 = vmatprep.subr.bf16.mxu0 %v648_v5  ;;  %434 = vmatprep.mubr.bf16.mxu0 %v575_v13 }
  0x22   : > { %602 = vmatpush3.bf16.msra.mxu0 %v649_v6 }
  0x23   : > { %603 = vmatprep.subr.bf16.mxu0 %v650_v7 }
  0x26   : > { %604 = vmatpush3.bf16.msra.mxu0 %v651_v8 }
  0x27   : > { %605 = vmatprep.subr.bf16.mxu0 %v652_v9 }
  0x2a   : > { %606 = vmatpush3.bf16.msra.mxu0 %v653_v10 }
  0x2b   : > { %607 = vmatprep.subr.bf16.mxu0 %v654_v11 }
  0x2e   : > { %608 = vmatpush3.bf16.msra.mxu0 %v655_v14 }
  0x2f   : > { %609 = vmatprep.subr.bf16.mxu0 %v656_v15 }
  0x32   : > { %610 = vmatpush3.bf16.msra.mxu0 %v657_v16 }
  0x33   : > { %611 = vmatprep.subr.bf16.mxu0 %v658_v17 }
  0x36   : > { %612 = vmatpush3.bf16.msra.mxu0 %v659_v18 }
  0x39   : > { %435 = vmatmul.mubr.bf16.vlgmr.msra.gmra.mrb[0].mxu0 %v574_v19 }
 0x10c   : > { %v613_v20 = vpop.f32.mrb[0].mxu0  ;;  %447 = sbr.rel (%p592_p7) target bundleno = 287 (0x11f), region = 40 }
 0x10d   : > { %v614_v22 = vpop.f32.mrb[1].mxu0 }
 0x10e   : > { %v615_v23 = vadd.f32 %v614_v22, %v613_v20  ;;  %v616_v24 = vpop.f32.mrb[2].mxu0 }
 0x10f   : > { %v617_v25 = vpop.f32.mrb[3].mxu0 }
 0x110   : > { %v442_v26 = vadd.f32 %v615_v23, %v265_v21 }
 0x112   : > { %443 = vst [vmem:[#allocation2] sm:$0xff] %v442_v26 }
 0x119   : > { %v448_v27 = vld [vmem:[#allocation2] sm:$0xff] }
 0x11a   : > { %v456_v29 = vadd.f32 %v593_v28, %v448_v27 }
 0x11c   : > { %v457_v30 = vpack.c.bf16 %v456_v29, %v456_v29 }
 0x11e   : > { %458 = vst [vmem:[%s773_s3] sm:$0xf] %v457_v30 }
 0x11f PF: > { %s13_s14 = sadd.s32 1, %s684_s14   ;;  %s774_s12 = smov %s680_s13 }
 0x120   : > { %p10_p8 = scmp.ge.s32.totalorder %s13_s14, 4   ;;  %s775_s13 = smov %s777_s15 }
 0x122   :  { %12 = sbr.rel (!%p10_p8) target bundleno = 2 (0x2), region = 76 }

// kernel: fwd.29
= control target key start
LH: loop header
LB: loop body
LE: loop exit
PB: predicated region body
PF: predicated region fallthrough
CT: control target
= control target key end

     0   :  { %s935_s12 = smov 0   ;;  %s937_s13 = smov 0   ;;  %s1022_s0 = inlined_call_operand.vmem [shape: bf16[2,1024], index: 0, kind: input, shape index: {}]   ;;  %s1023_s1 = inlined_call_operand.vmem [shape: bf16[1024,128], index: 1, kind: input, shape index: {}]   ;;  %s1024_s2 = inlined_call_operand.vmem [shape: f32[1,128], index: 2, kind: input, shape index: {}]   ;;  %s1025_s3 = inlined_call_operand.vmem [shape: bf16[2,128], index: 3, kind: output, shape index: {}]  }
   0x1   :  { %s939_s14 = smov 0  }
   0x2 LB: > { %s25_s15 = sadd.s32 1, %s907_s13  ;;  %p744_p0 = scmp.ge.s32.totalorder %s911_s14, 1  ;;  %s911_s14 = sphi %s939_s14, %s13_s14   ;;  %s907_s13 = sphi %s937_s13, %s1027_s13   ;;  %s903_s12 = sphi %s935_s12, %s1026_s12  }
   0x3   : > { %p26_p1 = scmp.ge.s32.totalorder %s25_s15, 2  ;;  %p188_p2 = scmp.lt.s32.totalorder %s911_s14, 3 }
   0x5   : > { %s1029_s15 = smov (%p26_p1, %s25_s15), 0  ;;  %p189_p3 = pnand %p744_p0, %p188_p2 }
   0x6   : > { %s745_s16 = sshll.u32 (!%p189_p3), %s903_s12, 2  ;;  %s746_s17 = sshll.u32 (!%p189_p3), %s903_s12, 6 }
   0x7   : > { %192 = sbr.rel (%p189_p3) target bundleno = 290 (0x122), region = 32  ;;  %p230_p4 = scmp.lt.s32.totalorder (!%p189_p3), %s745_s16, 7 }
   0x8   : > { %p237_p5 = scmp.lt.s32.totalorder (!%p189_p3), %s746_s17, 127  ;;  %p748_p6 = scmp.ne.s32.totalorder (!%p189_p3), %s903_s12, 0 }
   0xe   : > { %s1031_s16 = smov (!%p230_p4, %s745_s16), 7  ;;  %s1033_s17 = smov (!%p237_p5, %s746_s17), 127 }
   0xf   : > { %s234_s20 = scalar_lea.vmem %s1022_s0, %s1031_s16  ;;  %s747_s21 = sshll.u32 %s1033_s17, 2  ;;  %v913_v0 = vmov (!%p748_p6), 0.0  }
  0x10   : > { %s966_s24 = scalar_lea.vmem %s1023_s1, %s747_s21  ;;  %258 = sbr.rel (%p748_p6) target bundleno = 23 (0x17), region = 36  ;;  %259 = vst [vmem:[#allocation2] sm:$0x3] (!%p748_p6), %v913_v0 }
  0x17 PF: > { %v857_v1 = vld [vmem:[%s966_s24 + $0x40] sm:$0xff]   ;;  %v861_v5 = vld [vmem:[%s966_s24 + $0x48] sm:$0xff]   ;;  %v865_v9 = vld [vmem:[%s966_s24 + $0x50] sm:$0xff]   ;;  %v338_v31 = vlaneseq  ;;  %v914_v35 = vmov 1966171168   ;;  %p782_p7 = scmp.ne.s32.totalorder %s903_s12, 1 }
  0x18   : > { %v858_v2 = vld [vmem:[%s966_s24 + $0xc0] sm:$0xff]   ;;  %787 = vmatprep.subr.bf16.mxu0 %v857_v1  ;;  %v862_v6 = vld [vmem:[%s966_s24 + $0xc8] sm:$0xff]   ;;  %v866_v10 = vld [vmem:[%s966_s24 + $0xd0] sm:$0xff]   ;;  %v336_v36 = vunpack.c.l.s4 %v914_v35 }
  0x19   : > { %v859_v3 = vld [vmem:[%s966_s24] sm:$0xff]   ;;  %809 = vmatprep.subr.bf16.mxu1 %v858_v2  ;;  %v863_v7 = vld [vmem:[%s966_s24 + $0x8] sm:$0xff]   ;;  %v867_v11 = vld [vmem:[%s966_s24 + $0x10] sm:$0xff]   ;;  %v339_v37 = vshrl.u32 %v338_v31, 7 }
  0x1a   : > { %v860_v4 = vld [vmem:[%s966_s24 + $0x80] sm:$0xff]   ;;  %788 = vmatpush3.bf16.msra.mxu0 %v859_v3  ;;  %v864_v8 = vld [vmem:[%s966_s24 + $0x88] sm:$0xff]   ;;  %v868_v12 = vld [vmem:[%s966_s24 + $0x90] sm:$0xff]   ;;  %v337_v39 = vunpack.c.0.s8 %v336_v36 }
  0x1b   : > { %810 = vmatpush3.bf16.msra.mxu1 %v860_v4  ;;  %789 = vmatprep.subr.bf16.mxu0 %v861_v5  ;;  %v869_v13 = vld [vmem:[%s966_s24 + $0x58] sm:$0xff]   ;;  %v873_v17 = vld [vmem:[%s966_s24 + $0x60] sm:$0xff]   ;;  %v877_v21 = vld [vmem:[%s966_s24 + $0x68] sm:$0xff]  }
  0x1c   : > { %811 = vmatprep.subr.bf16.mxu1 %v862_v6  ;;  %v870_v14 = vld [vmem:[%s966_s24 + $0xd8] sm:$0xff]   ;;  %v874_v18 = vld [vmem:[%s966_s24 + $0xe0] sm:$0xff]   ;;  %v878_v22 = vld [vmem:[%s966_s24 + $0xe8] sm:$0xff]   ;;  %v340_v40 = vsub.s32 %v337_v39, %v339_v37 }
  0x1d   : > { %v871_v15 = vld [vmem:[%s966_s24 + $0x18] sm:$0xff]   ;;  %v875_v19 = vld [vmem:[%s966_s24 + $0x20] sm:$0xff]   ;;  %v879_v23 = vld [vmem:[%s966_s24 + $0x28] sm:$0xff]  }
  0x1e   : > { %790 = vmatpush3.bf16.msra.mxu0 %v863_v7  ;;  %v872_v16 = vld [vmem:[%s966_s24 + $0x98] sm:$0xff]   ;;  %v876_v20 = vld [vmem:[%s966_s24 + $0xa0] sm:$0xff]   ;;  %v880_v24 = vld [vmem:[%s966_s24 + $0xa8] sm:$0xff]  }
  0x1f   : > { %812 = vmatpush3.bf16.msra.mxu1 %v864_v8  ;;  %791 = vmatprep.subr.bf16.mxu0 %v865_v9  ;;  %v881_v25 = vld [vmem:[%s966_s24 + $0x70] sm:$0xff]   ;;  %v885_v29 = vld [vmem:[%s966_s24 + $0x78] sm:$0xff]   ;;  %v749_v34 = vld.sshfl [vmem:[%s234_s20] sm:$0x33 pattern:$0x75316420] }
  0x20   : > { %813 = vmatprep.subr.bf16.mxu1 %v866_v10  ;;  %v882_v26 = vld [vmem:[%s966_s24 + $0xf0] sm:$0xff]   ;;  %v886_v30 = vld [vmem:[%s966_s24 + $0xf8] sm:$0xff]   ;;  %v334_v38 = vcombine.high %v749_v34, %v749_v34  ;;  %v341_v42 = vrot.slane %v749_v34, %v340_v40  ;;  %v260_v54 = vld [vmem:[#allocation2] sm:$0x3] }
  0x21   : > { %v883_v27 = vld [vmem:[%s966_s24 + $0x30] sm:$0xff]   ;;  %v887_v32 = vld [vmem:[%s966_s24 + $0x38] sm:$0xff]   ;;  %v783_v59 = vld [vmem:[%s1024_s2] ss:$0 sm:$0xff] (!%p782_p7) }
  0x22   : > { %792 = vmatpush3.bf16.msra.mxu0 %v867_v11  ;;  %v884_v28 = vld [vmem:[%s966_s24 + $0xb0] sm:$0xff]   ;;  %v888_v33 = vld [vmem:[%s966_s24 + $0xb8] sm:$0xff]   ;;  %v348_v41 = vrot.slane %v334_v38, %v340_v40  ;;  %v349_v44 = vcombine.high %v341_v42, %v341_v42 }
  0x23   : > { %814 = vmatpush3.bf16.msra.mxu1 %v868_v12  ;;  %793 = vmatprep.subr.bf16.mxu0 %v869_v13 }
  0x24   : > { %815 = vmatprep.subr.bf16.mxu1 %v870_v14  ;;  %579 = vmatprep.mubr.bf16.mxu0 %v348_v41  ;;  %v350_v43 = vcombine.high %v348_v41, %v348_v41 }
  0x26   : > { %794 = vmatpush3.bf16.msra.mxu0 %v871_v15  ;;  %619 = vmatprep.mubr.bf16.mxu1 %v350_v43 }
  0x27   : > { %816 = vmatpush3.bf16.msra.mxu1 %v872_v16  ;;  %795 = vmatprep.subr.bf16.mxu0 %v873_v17 }
  0x28   : > { %817 = vmatprep.subr.bf16.mxu1 %v874_v18 }
  0x2a   : > { %796 = vmatpush3.bf16.msra.mxu0 %v875_v19 }
  0x2b   : > { %818 = vmatpush3.bf16.msra.mxu1 %v876_v20  ;;  %797 = vmatprep.subr.bf16.mxu0 %v877_v21 }
  0x2c   : > { %819 = vmatprep.subr.bf16.mxu1 %v878_v22 }
  0x2e   : > { %798 = vmatpush3.bf16.msra.mxu0 %v879_v23 }
  0x2f   : > { %820 = vmatpush3.bf16.msra.mxu1 %v880_v24  ;;  %799 = vmatprep.subr.bf16.mxu0 %v881_v25 }
  0x30   : > { %821 = vmatprep.subr.bf16.mxu1 %v882_v26 }
  0x32   : > { %800 = vmatpush3.bf16.msra.mxu0 %v883_v27 }
  0x33   : > { %822 = vmatpush3.bf16.msra.mxu1 %v884_v28  ;;  %801 = vmatprep.subr.bf16.mxu0 %v885_v29 }
  0x34   : > { %823 = vmatprep.subr.bf16.mxu1 %v886_v30 }
  0x36   : > { %802 = vmatpush3.bf16.msra.mxu0 %v887_v32 }
  0x37   : > { %824 = vmatpush3.bf16.msra.mxu1 %v888_v33 }
  0x39   : > { %580 = vmatmul.mubr.bf16.vlgmr.msra.gmra.mrb[0].mxu0 %v341_v42 }
  0x3a   : > { %620 = vmatmul.mubr.bf16.vlgmr.msra.gmra.mrb[0].mxu1 %v349_v44 }
 0x10c   : > { %v803_v45 = vpop.f32.mrb[0].mxu0 }
 0x10d   : > { %v804_v46 = vpop.f32.mrb[1].mxu0  ;;  %v825_v47 = vpop.f32.mrb[0].mxu1 }
 0x10e   : > { %v805_v48 = vadd.f32 %v804_v46, %v803_v45  ;;  %v806_v49 = vpop.f32.mrb[2].mxu0  ;;  %v826_v50 = vpop.f32.mrb[1].mxu1 }
 0x10f   : > { %v807_v51 = vpop.f32.mrb[3].mxu0  ;;  %v827_v52 = vadd.f32 %v826_v50, %v825_v47  ;;  %v828_v53 = vpop.f32.mrb[2].mxu1  ;;  %632 = sbr.rel (%p782_p7) target bundleno = 290 (0x122), region = 40 }
 0x110   : > { %v829_v55 = vpop.f32.mrb[3].mxu1 }
 0x111   : > { %v622_v56 = vadd.f32 %v827_v52, %v805_v48 }
 0x113   : > { %v627_v57 = vadd.f32 %v622_v56, %v260_v54 }
 0x115   : > { %628 = vst [vmem:[#allocation2] sm:$0x3] %v627_v57 }
 0x11c   : > { %v633_v58 = vld [vmem:[#allocation2] sm:$0x3] }
 0x11d   : > { %v641_v60 = vadd.f32 %v783_v59, %v633_v58 }
 0x11f   : > { %v642_v61 = vpack.c.bf16 %v641_v60, %v641_v60 }
 0x121   : > { %643 = vst [vmem:[%s1025_s3] sm:$0x1] %v642_v61 }
 0x122 PF: > { %s13_s14 = sadd.s32 1, %s911_s14   ;;  %s1026_s12 = smov %s907_s13 }
 0x123   : > { %p10_p8 = scmp.ge.s32.totalorder %s13_s14, 4   ;;  %s1027_s13 = smov %s1029_s15 }
 0x125   :  { %12 = sbr.rel (!%p10_p8) target bundleno = 2 (0x2), region = 76 }

// kernel: fwd.30
= control target key start
LH: loop header
LB: loop body
LE: loop exit
PB: predicated region body
PF: predicated region fallthrough
CT: control target
= control target key end

     0   :  { %s606_s12 = smov 0   ;;  %s608_s13 = smov 0   ;;  %s660_s0 = inlined_call_operand.vmem [shape: bf16[2,256], index: 0, kind: input, shape index: {}]   ;;  %s661_s1 = inlined_call_operand.vmem [shape: bf16[256,128], index: 1, kind: input, shape index: {}]   ;;  %s662_s2 = inlined_call_operand.vmem [shape: f32[1,128], index: 2, kind: input, shape index: {}]   ;;  %s663_s3 = inlined_call_operand.vmem [shape: bf16[2,128], index: 3, kind: output, shape index: {}]  }
   0x1   :  { %s610_s14 = smov 0  }
   0x2 LB: > { %s25_s15 = sadd.s32 1, %s577_s13  ;;  %p478_p0 = scmp.ge.s32.totalorder %s581_s14, 1  ;;  %s581_s14 = sphi %s610_s14, %s13_s14   ;;  %s577_s13 = sphi %s608_s13, %s665_s13   ;;  %s573_s12 = sphi %s606_s12, %s664_s12  }
   0x3   : > { %p26_p1 = scmp.ge.s32.totalorder %s25_s15, 2  ;;  %p186_p2 = scmp.lt.s32.totalorder %s581_s14, 3 }
   0x5   : > { %s667_s15 = smov (%p26_p1, %s25_s15), 0  ;;  %p187_p3 = pnand %p478_p0, %p186_p2 }
   0x6   : > { %p226_p4 = scmp.lt.s32.totalorder (!%p187_p3), %s573_s12, 1  ;;  %s479_s16 = sshll.u32 (!%p187_p3), %s573_s12, 4 }
   0x7   : > { %190 = sbr.rel (%p187_p3) target bundleno = 282 (0x11a), region = 32  ;;  %p232_p5 = scmp.lt.s32.totalorder (!%p187_p3), %s479_s16, 31 }
   0x8   : > { %p481_p6 = scmp.ne.s32.totalorder (!%p187_p3), %s573_s12, 0 }
   0xe   : > { %s629_s17 = scalar_select %p226_p4, %s573_s12, 1 }
   0xf   : > { %s669_s16 = smov (!%p232_p5, %s479_s16), 31  ;;  %253 = sbr.rel (%p481_p6) target bundleno = 22 (0x16), region = 36 }
  0x10   : > { %s230_s20 = scalar_lea.vmem %s660_s0, %s629_s17  ;;  %s480_s21 = sshll.u32 %s669_s16, 2  ;;  %v583_v0 = vmov (!%p481_p6), 0.0  }
  0x11   : > { %s238_s24 = scalar_lea.vmem %s661_s1, %s480_s21  ;;  %254 = vst [vmem:[#allocation2] sm:$0x3] (!%p481_p6), %v583_v0 }
  0x16 PF: > { %v551_v1 = vld [vmem:[%s238_s24] sm:$0xff]   ;;  %v584_v2 = vmov 0.0   ;;  %v552_v3 = vld [vmem:[%s238_s24 + $0x8] sm:$0xff]   ;;  %vm585_vm0 = vmmov 0   ;;  %v553_v4 = vld [vmem:[%s238_s24 + $0x10] sm:$0xff]   ;;  %p490_p7 = scmp.ne.s32.totalorder %s573_s12, 1 }
  0x17   : > { %504 = vmatprep.subr.bf16.mxu0 %v584_v2  ;;  %520 = vmatprep.mubr.msk.bf16.mxu0 %vm585_vm0, %v584_v2  ;;  %v554_v5 = vld [vmem:[%s238_s24 + $0x18] sm:$0xff]   ;;  %v555_v6 = vld [vmem:[%s238_s24 + $0x20] sm:$0xff]   ;;  %v556_v7 = vld [vmem:[%s238_s24 + $0x28] sm:$0xff]  }
  0x18   : > { %505 = vmatpush3.bf16.msra.mxu0 %v551_v1  ;;  %v557_v8 = vld [vmem:[%s238_s24 + $0x30] sm:$0xff]   ;;  %v558_v9 = vld [vmem:[%s238_s24 + $0x38] sm:$0xff]   ;;  %v256_v10 = vld [vmem:[%s230_s20] sm:$0x1] }
  0x19   : > { %506 = vmatprep.subr.bf16.mxu0 %v584_v2  ;;  %v255_v11 = vld [vmem:[#allocation2] sm:$0x3] }
  0x1a   : > { %v491_v18 = vld [vmem:[%s662_s2] ss:$0 sm:$0xff] (!%p490_p7) }
  0x1c   : > { %507 = vmatpush3.bf16.msra.mxu0 %v552_v3 }
  0x1d   : > { %508 = vmatprep.subr.bf16.mxu0 %v584_v2 }
  0x20   : > { %509 = vmatpush3.bf16.msra.mxu0 %v553_v4 }
  0x21   : > { %510 = vmatprep.subr.bf16.mxu0 %v584_v2 }
  0x24   : > { %511 = vmatpush3.bf16.msra.mxu0 %v554_v5 }
  0x25   : > { %512 = vmatprep.subr.bf16.mxu0 %v584_v2 }
  0x28   : > { %513 = vmatpush3.bf16.msra.mxu0 %v555_v6 }
  0x29   : > { %514 = vmatprep.subr.bf16.mxu0 %v584_v2 }
  0x2c   : > { %515 = vmatpush3.bf16.msra.mxu0 %v556_v7 }
  0x2d   : > { %516 = vmatprep.subr.bf16.mxu0 %v584_v2 }
  0x30   : > { %517 = vmatpush3.bf16.msra.mxu0 %v557_v8 }
  0x31   : > { %518 = vmatprep.subr.bf16.mxu0 %v584_v2 }
  0x34   : > { %519 = vmatpush3.bf16.msra.mxu0 %v558_v9 }
  0x37   : > { %521 = vmatmul.mubr.bf16.vlgmr.msra.gmra.mrb[0].mxu0 %v256_v10 }
 0x107   : > { %366 = sbr.rel (%p490_p7) target bundleno = 282 (0x11a), region = 40 }
 0x10a   : > { %v355_v12 = vpop.f32.mrb[0].mxu0 }
 0x10b   : > { %v361_v13 = vadd.f32 %v355_v12, %v255_v11  ;;  %v522_v14 = vpop.f32.mrb[1].mxu0 }
 0x10c   : > { %v358_v15 = vpop.f32.mrb[2].mxu0 }
 0x10d   : > { %362 = vst [vmem:[#allocation2] sm:$0x3] %v361_v13  ;;  %v523_v16 = vpop.f32.mrb[3].mxu0 }
 0x114   : > { %v367_v17 = vld [vmem:[#allocation2] sm:$0x3] }
 0x115   : > { %v375_v19 = vadd.f32 %v491_v18, %v367_v17 }
 0x117   : > { %v376_v20 = vpack.c.bf16 %v375_v19, %v375_v19 }
 0x119   : > { %377 = vst [vmem:[%s663_s3] sm:$0x1] %v376_v20 }
 0x11a PF: > { %s13_s14 = sadd.s32 1, %s581_s14   ;;  %s664_s12 = smov %s577_s13 }
 0x11b   : > { %p10_p8 = scmp.ge.s32.totalorder %s13_s14, 4   ;;  %s665_s13 = smov %s667_s15 }
 0x11d   :  { %12 = sbr.rel (!%p10_p8) target bundleno = 2 (0x2), region = 76 }

// kernel: fwd.46
= control target key start
LH: loop header
LB: loop body
LE: loop exit
PB: predicated region body
PF: predicated region fallthrough
CT: control target
= control target key end

     0   :  { %s1265_s12 = smov 0   ;;  %s1267_s13 = smov 0   ;;  %s1419_s0 = inlined_call_operand.vmem [shape: bf16[512,64], index: 0, kind: input, shape index: {}]   ;;  %s1420_s1 = inlined_call_operand.vmem [shape: bf16[64,128], index: 1, kind: input, shape index: {}]   ;;  %s1421_s2 = inlined_call_operand.vmem [shape: f32[1,128], index: 2, kind: input, shape index: {}]   ;;  %s1422_s3 = inlined_call_operand.vmem [shape: f32[512,128], index: 3, kind: output, shape index: {}]  }
   0x1   :  { %s1269_s14 = smov 0  }
   0x2 LB: > { %s32_s15 = sadd.s32 1, %s1239_s13  ;;  %p1001_p0 = scmp.ge.s32.totalorder %s1243_s14, 1  ;;  %s1243_s14 = sphi %s1269_s14, %s13_s14   ;;  %s1239_s13 = sphi %s1267_s13, %s1424_s13   ;;  %s1235_s12 = sphi %s1265_s12, %s1423_s12  }
   0x3   : > { %p34_p1 = scmp.ge.s32.totalorder %s32_s15, 2  ;;  %p188_p2 = scmp.lt.s32.totalorder %s1243_s14, 3 }
   0x5   : > { %s1426_s15 = smov (%p34_p1, %s32_s15), 0  ;;  %p189_p3 = pnand %p1001_p0, %p188_p2 }
   0x6   : > { %v1137_v0 = vld [vmem:[%s1420_s1] sm:$0xff] (!%p189_p3)   ;;  %s1002_s18 = sshll.u32 (!%p189_p3), %s1235_s12, 5  ;;  %v1138_v1 = vld [vmem:[%s1420_s1 + $0x8] sm:$0xff] (!%p189_p3)   ;;  %v1139_v2 = vld [vmem:[%s1420_s1 + $0x10] sm:$0xff] (!%p189_p3)   ;;  %vm472_vm0 = vcmask (!%p189_p3), 523264  }
   0x7   : > { %192 = sbr.rel (%p189_p3) target bundleno = 283 (0x11b), region = 32  ;;  %p230_p4 = scmp.lt.s32.totalorder (!%p189_p3), %s1002_s18, 63  ;;  %1065 = vmatprep.subr.bf16.mxu0 (!%p189_p3), %v1137_v0  ;;  %1105 = vmatprep.subr.bf16.mxu1 (!%p189_p3), %v1137_v0  ;;  %v1140_v3 = vld [vmem:[%s1420_s1 + $0x18] sm:$0xff] (!%p189_p3)   ;;  %v1338_v20 = vld [vmem:[%s1421_s2] ss:$0 sm:$0xff] (!%p189_p3) }
   0x8   : > { %1066 = vmatpush3.bf16.msra.mxu0 (!%p189_p3), %v1137_v0  ;;  %1109 = vmatpush3.bf16.msra.mxu1 (!%p189_p3), %v1137_v0 }
   0x9   : > { %1067 = vmatprep.subr.bf16.mxu0 (!%p189_p3), %v1138_v1  ;;  %1106 = vmatprep.subr.bf16.mxu1 (!%p189_p3), %v1138_v1 }
   0xc   : > { %1068 = vmatpush3.bf16.msra.mxu0 (!%p189_p3), %v1138_v1  ;;  %1110 = vmatpush3.bf16.msra.mxu1 (!%p189_p3), %v1138_v1 }
   0xd   : > { %1069 = vmatprep.subr.bf16.mxu0 (!%p189_p3), %v1139_v2  ;;  %1107 = vmatprep.subr.bf16.mxu1 (!%p189_p3), %v1139_v2 }
   0xe   : > { %s1428_s18 = smov (!%p230_p4, %s1002_s18), 63 }
   0xf   : > { %s1003_s23 = sshll.u32 %s1428_s18, 2  ;;  %s1005_s4 = sshll.u32 %s1428_s18, 3 }
  0x10   : > { %s1301_s28 = scalar_lea.vmem %s1419_s0, %s1003_s23  ;;  %1070 = vmatpush3.bf16.msra.mxu0 %v1139_v2  ;;  %1111 = vmatpush3.bf16.msra.mxu1 %v1139_v2  ;;  %s1356_s7 = scalar_lea.vmem %s1422_s3, %s1005_s4 }
  0x11   : > { %v1141_v4 = vld [vmem:[%s1301_s28] sm:$0xff]   ;;  %1071 = vmatprep.subr.bf16.mxu0 %v1140_v3  ;;  %1108 = vmatprep.subr.bf16.mxu1 %v1140_v3  ;;  %v1143_v6 = vld [vmem:[%s1301_s28 + $0x8] sm:$0xff]   ;;  %v1145_v8 = vld [vmem:[%s1301_s28 + $0x10] sm:$0xff]  }
  0x12   : > { %v1142_v5 = vld [vmem:[%s1301_s28 + $0x40] sm:$0xff]   ;;  %1073 = vmatprep.mubr.msk.bf16.mxu0 %vm472_vm0, %v1141_v4  ;;  %v1144_v7 = vld [vmem:[%s1301_s28 + $0x48] sm:$0xff]   ;;  %v1146_v9 = vld [vmem:[%s1301_s28 + $0x50] sm:$0xff]  }
  0x13   : > { %1089 = vmatprep.mubr.msk.bf16.mxu1 %vm472_vm0, %v1142_v5  ;;  %v1147_v10 = vld [vmem:[%s1301_s28 + $0x18] sm:$0xff]   ;;  %v1149_v12 = vld [vmem:[%s1301_s28 + $0x20] sm:$0xff]   ;;  %v1151_v14 = vld [vmem:[%s1301_s28 + $0x28] sm:$0xff]  }
  0x14   : > { %1072 = vmatpush3.bf16.msra.mxu0 %v1140_v3  ;;  %1112 = vmatpush3.bf16.msra.mxu1 %v1140_v3  ;;  %v1148_v11 = vld [vmem:[%s1301_s28 + $0x58] sm:$0xff]   ;;  %v1150_v13 = vld [vmem:[%s1301_s28 + $0x60] sm:$0xff]   ;;  %v1152_v15 = vld [vmem:[%s1301_s28 + $0x68] sm:$0xff]  }
  0x15   : > { %v1153_v16 = vld [vmem:[%s1301_s28 + $0x30] sm:$0xff]   ;;  %v1155_v18 = vld [vmem:[%s1301_s28 + $0x38] sm:$0xff]  }
  0x16   : > { %v1154_v17 = vld [vmem:[%s1301_s28 + $0x70] sm:$0xff]   ;;  %v1156_v19 = vld [vmem:[%s1301_s28 + $0x78] sm:$0xff]  }
  0x17   : > { %1074 = vmatmul.mubr.msk.bf16.vlgmr.msra.gmra.mrb[0].mxu0 %vm472_vm0, %v1143_v6  ;;  %1090 = vmatmul.mubr.msk.bf16.vlgmr.msra.gmra.mrb[0].mxu1 %vm472_vm0, %v1144_v7 }
  0x18   : > { %1077 = vmatprep.mubr.msk.bf16.mxu0 %vm472_vm0, %v1145_v8  ;;  %1093 = vmatprep.mubr.msk.bf16.mxu1 %vm472_vm0, %v1146_v9 }
  0x1f   : > { %1078 = vmatmul.mubr.msk.bf16.gmra.mrb[4].mxu0 %vm472_vm0, %v1147_v10  ;;  %1094 = vmatmul.mubr.msk.bf16.gmra.mrb[4].mxu1 %vm472_vm0, %v1148_v11 }
  0x20   : > { %1081 = vmatprep.mubr.msk.bf16.mxu0 %vm472_vm0, %v1149_v12  ;;  %1097 = vmatprep.mubr.msk.bf16.mxu1 %vm472_vm0, %v1150_v13 }
  0x27   : > { %1082 = vmatmul.mubr.msk.bf16.gmra.mrb[8].mxu0 %vm472_vm0, %v1151_v14  ;;  %1098 = vmatmul.mubr.msk.bf16.gmra.mrb[8].mxu1 %vm472_vm0, %v1152_v15 }
  0x28   : > { %1085 = vmatprep.mubr.msk.bf16.mxu0 %vm472_vm0, %v1153_v16  ;;  %1101 = vmatprep.mubr.msk.bf16.mxu1 %vm472_vm0, %v1154_v17 }
  0x2f   : > { %1086 = vmatmul.mubr.msk.bf16.gmra.mrb[12].mxu0 %vm472_vm0, %v1155_v18  ;;  %1102 = vmatmul.mubr.msk.bf16.gmra.mrb[12].mxu1 %vm472_vm0, %v1156_v19 }
  0xea   : > { %v1075_v21 = vpop.f32.mrb[0].mxu0  ;;  %v1091_v22 = vpop.f32.mrb[0].mxu1 }
  0xeb   : > { %v790_v23 = vadd.f32 %v1075_v21, %v1338_v20  ;;  %v806_v24 = vadd.f32 %v1091_v22, %v1338_v20  ;;  %v555_v25 = vpop.f32.mrb[1].mxu0  ;;  %v619_v26 = vpop.f32.mrb[1].mxu1 }
  0xec   : > { %v788_v27 = vadd.f32 %v1338_v20, %v555_v25  ;;  %v804_v28 = vadd.f32 %v1338_v20, %v619_v26  ;;  %v1076_v29 = vpop.f32.mrb[2].mxu0  ;;  %v1092_v30 = vpop.f32.mrb[2].mxu1 }
  0xed   : > { %1157 = vtanh.f32 %v790_v23  ;;  %v791_v31 = vadd.f32 %v1076_v29, %v1338_v20  ;;  %v558_v32 = vpop.f32.mrb[3].mxu0  ;;  %v622_v33 = vpop.f32.mrb[3].mxu1  ;;  %v807_v34 = vadd.f32 %v1092_v30, %v1338_v20 }
  0xee   : > { %1159 = vtanh.f32 %v806_v24  ;;  %v789_v35 = vadd.f32 %v1338_v20, %v558_v32  ;;  %v805_v36 = vadd.f32 %v1338_v20, %v622_v33 }
  0xef   : > { %1161 = vtanh.f32 %v788_v27 }
  0xf0   : > { %1163 = vtanh.f32 %v804_v28 }
  0xf1   : > { %1165 = vtanh.f32 %v791_v31 }
  0xf2   : > { %1167 = vtanh.f32 %v807_v34  ;;  %v1079_v37 = vpop.f32.mrb[4].mxu0  ;;  %v1095_v38 = vpop.f32.mrb[4].mxu1 }
  0xf3   : > { %1169 = vtanh.f32 %v789_v35  ;;  %v794_v39 = vadd.f32 %v1079_v37, %v1338_v20  ;;  %v810_v40 = vadd.f32 %v1095_v38, %v1338_v20  ;;  %v571_v41 = vpop.f32.mrb[5].mxu0  ;;  %v635_v42 = vpop.f32.mrb[5].mxu1 }
  0xf4   : > { %1171 = vtanh.f32 %v805_v36  ;;  %v792_v43 = vadd.f32 %v1338_v20, %v571_v41  ;;  %v808_v44 = vadd.f32 %v1338_v20, %v635_v42  ;;  %v1080_v45 = vpop.f32.mrb[6].mxu0  ;;  %v1096_v46 = vpop.f32.mrb[6].mxu1 }
  0xf5   : > { %1173 = vtanh.f32 %v794_v39  ;;  %v795_v47 = vadd.f32 %v1080_v45, %v1338_v20  ;;  %v574_v48 = vpop.f32.mrb[7].mxu0  ;;  %v638_v49 = vpop.f32.mrb[7].mxu1  ;;  %v811_v50 = vadd.f32 %v1096_v46, %v1338_v20 }
  0xf6   : > { %1175 = vtanh.f32 %v810_v40  ;;  %v793_v52 = vadd.f32 %v1338_v20, %v574_v48  ;;  %v809_v54 = vadd.f32 %v1338_v20, %v638_v49 }
  0xf7   : > { %v1158_v51 = vpop.eup %1157  ;;  %1177 = vtanh.f32 %v792_v43 }
  0xf8   : > { %v1160_v53 = vpop.eup %1159  ;;  %854 = vst [vmem:[%s1356_s7 + $0x10] sm:$0xff] %v1158_v51  ;;  %1179 = vtanh.f32 %v808_v44 }
  0xf9   : > { %v1162_v55 = vpop.eup %1161  ;;  %870 = vst [vmem:[%s1356_s7 + $0x90] sm:$0xff] %v1160_v53  ;;  %1181 = vtanh.f32 %v795_v47 }
  0xfa   : > { %v1164_v56 = vpop.eup %1163  ;;  %852 = vst [vmem:[%s1356_s7] sm:$0xff] %v1162_v55  ;;  %1183 = vtanh.f32 %v811_v50  ;;  %v1083_v57 = vpop.f32.mrb[8].mxu0 }
  0xfb   : > { %v1099_v58 = vpop.f32.mrb[8].mxu1  ;;  %v1166_v59 = vpop.eup %1165  ;;  %868 = vst [vmem:[%s1356_s7 + $0x80] sm:$0xff] %v1164_v56  ;;  %1185 = vtanh.f32 %v793_v52  ;;  %v798_v60 = vadd.f32 %v1083_v57, %v1338_v20 }
  0xfc   : > { %v814_v61 = vadd.f32 %v1099_v58, %v1338_v20  ;;  %v587_v62 = vpop.f32.mrb[9].mxu0  ;;  %v651_v63 = vpop.f32.mrb[9].mxu1  ;;  %855 = vst [vmem:[%s1356_s7 + $0x18] sm:$0xff] %v1166_v59  ;;  %1187 = vtanh.f32 %v809_v54 }
  0xfd   : > { %v1168_v0 = vpop.eup %1167  ;;  %v796_v1 = vadd.f32 %v1338_v20, %v587_v62  ;;  %v812_v2 = vadd.f32 %v1338_v20, %v651_v63  ;;  %v1084_v3 = vpop.f32.mrb[10].mxu0  ;;  %1189 = vtanh.f32 %v798_v60 }
  0xfe   : > { %v1100_v4 = vpop.f32.mrb[10].mxu1  ;;  %v1170_v5 = vpop.eup %1169  ;;  %871 = vst [vmem:[%s1356_s7 + $0x98] sm:$0xff] %v1168_v0  ;;  %v799_v6 = vadd.f32 %v1084_v3, %v1338_v20  ;;  %1191 = vtanh.f32 %v814_v61 }
  0xff   : > { %v590_v7 = vpop.f32.mrb[11].mxu0  ;;  %v654_v8 = vpop.f32.mrb[11].mxu1  ;;  %853 = vst [vmem:[%s1356_s7 + $0x8] sm:$0xff] %v1170_v5  ;;  %v815_v10 = vadd.f32 %v1100_v4, %v1338_v20  ;;  %1193 = vtanh.f32 %v796_v1 }
 0x100   : > { %v1172_v9 = vpop.eup %1171  ;;  %v797_v12 = vadd.f32 %v1338_v20, %v590_v7  ;;  %1195 = vtanh.f32 %v812_v2  ;;  %v813_v14 = vadd.f32 %v1338_v20, %v654_v8 }
 0x101   : > { %v1174_v11 = vpop.eup %1173  ;;  %869 = vst [vmem:[%s1356_s7 + $0x88] sm:$0xff] %v1172_v9  ;;  %1197 = vtanh.f32 %v799_v6 }
 0x102   : > { %v1176_v13 = vpop.eup %1175  ;;  %858 = vst [vmem:[%s1356_s7 + $0x30] sm:$0xff] %v1174_v11  ;;  %1199 = vtanh.f32 %v815_v10  ;;  %v1087_v17 = vpop.f32.mrb[12].mxu0 }
 0x103   : > { %v1178_v15 = vpop.eup %1177  ;;  %874 = vst [vmem:[%s1356_s7 + $0xb0] sm:$0xff] %v1176_v13  ;;  %v1103_v18 = vpop.f32.mrb[12].mxu1  ;;  %1201 = vtanh.f32 %v797_v12  ;;  %v802_v21 = vadd.f32 %v1087_v17, %v1338_v20 }
 0x104   : > { %v1180_v16 = vpop.eup %1179  ;;  %856 = vst [vmem:[%s1356_s7 + $0x20] sm:$0xff] %v1178_v15  ;;  %v818_v22 = vadd.f32 %v1103_v18, %v1338_v20  ;;  %v603_v23 = vpop.f32.mrb[13].mxu0  ;;  %1203 = vtanh.f32 %v813_v14 }
 0x105   : > { %v1182_v19 = vpop.eup %1181  ;;  %872 = vst [vmem:[%s1356_s7 + $0xa0] sm:$0xff] %v1180_v16  ;;  %v667_v24 = vpop.f32.mrb[13].mxu1  ;;  %v800_v26 = vadd.f32 %v1338_v20, %v603_v23  ;;  %1205 = vtanh.f32 %v802_v21 }
 0x106   : > { %v1184_v25 = vpop.eup %1183  ;;  %859 = vst [vmem:[%s1356_s7 + $0x38] sm:$0xff] %v1182_v19  ;;  %v816_v27 = vadd.f32 %v1338_v20, %v667_v24  ;;  %v1088_v28 = vpop.f32.mrb[14].mxu0  ;;  %1207 = vtanh.f32 %v818_v22 }
 0x107   : > { %v1104_v29 = vpop.f32.mrb[14].mxu1  ;;  %v1186_v30 = vpop.eup %1185  ;;  %875 = vst [vmem:[%s1356_s7 + $0xb8] sm:$0xff] %v1184_v25  ;;  %v803_v31 = vadd.f32 %v1088_v28, %v1338_v20  ;;  %1209 = vtanh.f32 %v800_v26 }
 0x108   : > { %v606_v32 = vpop.f32.mrb[15].mxu0  ;;  %v670_v33 = vpop.f32.mrb[15].mxu1  ;;  %857 = vst [vmem:[%s1356_s7 + $0x28] sm:$0xff] %v1186_v30  ;;  %v819_v35 = vadd.f32 %v1104_v29, %v1338_v20  ;;  %1211 = vtanh.f32 %v816_v27 }
 0x109   : > { %v1188_v34 = vpop.eup %1187  ;;  %v801_v37 = vadd.f32 %v1338_v20, %v606_v32  ;;  %v817_v39 = vadd.f32 %v1338_v20, %v670_v33  ;;  %1213 = vtanh.f32 %v803_v31 }
 0x10a   : > { %v1190_v36 = vpop.eup %1189  ;;  %873 = vst [vmem:[%s1356_s7 + $0xa8] sm:$0xff] %v1188_v34  ;;  %1215 = vtanh.f32 %v819_v35 }
 0x10b   : > { %v1192_v38 = vpop.eup %1191  ;;  %862 = vst [vmem:[%s1356_s7 + $0x50] sm:$0xff] %v1190_v36  ;;  %1217 = vtanh.f32 %v801_v37 }
 0x10c   : > { %v1194_v40 = vpop.eup %1193  ;;  %878 = vst [vmem:[%s1356_s7 + $0xd0] sm:$0xff] %v1192_v38  ;;  %1219 = vtanh.f32 %v817_v39 }
 0x10d   : > { %v1196_v41 = vpop.eup %1195  ;;  %860 = vst [vmem:[%s1356_s7 + $0x40] sm:$0xff] %v1194_v40 }
 0x10e   : > { %v1198_v42 = vpop.eup %1197  ;;  %876 = vst [vmem:[%s1356_s7 + $0xc0] sm:$0xff] %v1196_v41 }
 0x10f   : > { %v1200_v43 = vpop.eup %1199  ;;  %863 = vst [vmem:[%s1356_s7 + $0x58] sm:$0xff] %v1198_v42 }
 0x110   : > { %v1202_v20 = vpop.eup %1201  ;;  %879 = vst [vmem:[%s1356_s7 + $0xd8] sm:$0xff] %v1200_v43 }
 0x111   : > { %v1204_v44 = vpop.eup %1203  ;;  %861 = vst [vmem:[%s1356_s7 + $0x48] sm:$0xff] %v1202_v20 }
 0x112   : > { %v1206_v45 = vpop.eup %1205  ;;  %877 = vst [vmem:[%s1356_s7 + $0xc8] sm:$0xff] %v1204_v44 }
 0x113   : > { %v1208_v46 = vpop.eup %1207  ;;  %866 = vst [vmem:[%s1356_s7 + $0x70] sm:$0xff] %v1206_v45 }
 0x114   : > { %v1210_v47 = vpop.eup %1209  ;;  %882 = vst [vmem:[%s1356_s7 + $0xf0] sm:$0xff] %v1208_v46 }
 0x115   : > { %v1212_v48 = vpop.eup %1211  ;;  %864 = vst [vmem:[%s1356_s7 + $0x60] sm:$0xff] %v1210_v47 }
 0x116   : > { %v1214_v49 = vpop.eup %1213  ;;  %880 = vst [vmem:[%s1356_s7 + $0xe0] sm:$0xff] %v1212_v48 }
 0x117   : > { %v1216_v50 = vpop.eup %1215  ;;  %867 = vst [vmem:[%s1356_s7 + $0x78] sm:$0xff] %v1214_v49 }
 0x118   : > { %v1218_v51 = vpop.eup %1217  ;;  %883 = vst [vmem:[%s1356_s7 + $0xf8] sm:$0xff] %v1216_v50 }
 0x119   : > { %v1220_v52 = vpop.eup %1219  ;;  %865 = vst [vmem:[%s1356_s7 + $0x68] sm:$0xff] %v1218_v51 }
 0x11a   : > { %881 = vst [vmem:[%s1356_s7 + $0xe8] sm:$0xff] %v1220_v52 }
 0x11b PF: > { %s13_s14 = sadd.s32 1, %s1243_s14   ;;  %s1423_s12 = smov %s1239_s13 }
 0x11c   : > { %p10_p5 = scmp.ge.s32.totalorder %s13_s14, 4   ;;  %s1424_s13 = smov %s1426_s15 }
 0x11e   :  { %12 = sbr.rel (!%p10_p5) target bundleno = 2 (0x2), region = 76 }

</bundles_post_ra>
